<compile_context>
chip_gen: v7x
topology: tpu7x:2x2x1
jax: 0.10.0
libtpu: 0.0.40
codegen_flags: <defaults>
</compile_context>

<pallas_src>
import numpy as np
import jax
import jax.numpy as jnp
from jax.experimental import pallas as pl
from jax.experimental.pallas import tpu as pltpu

# ---- problem sizes -----------------------------------------------------------------
B = 2          # batch
T = 8          # sequence length
D = 128        # input_dim == D_rnn == temporal_conv_output_dim == RG-LRU hidden dim
DM = 3 * D     # Gated_MLP expansion (expansion_factor = 3)
BT = B * T

RGLRU_C = 8.0
RMS_EPS = 1e-8   # TODO(synk): RMSNorm class is not included in the spec; standard
                 # RMSNorm (x * rsqrt(mean(x^2, -1) + eps) * weight) is assumed.

_SQRT_2_OVER_PI = 0.7978845608028654
_INV_SQRT2 = 0.7071067811865476

# ---- segmented-scan constants (trace-time only, depend on B/T which are static) -----
# Hillis–Steele inclusive scan of h_t = a_t*h_{t-1} + g_t over rows r = b*T + t with
# segment resets at batch boundaries. Step d combines row r with row r-d iff
# (r % T) >= d; SCAN_S[d] is that 0/1 shift matrix (zero across batch boundaries),
# SCAN_F[d] adds 1.0 to the shifted cumulative-'a' at rows that must stay unchanged.
SCAN_SHIFTS = tuple(2 ** i for i in range(max(1, (T - 1).bit_length())))   # (1, 2, 4)
NSTEPS = len(SCAN_SHIFTS)
SCAN_S = np.zeros((NSTEPS, BT, BT), np.float32)
SCAN_F = np.zeros((NSTEPS, BT, D), np.float32)
for _i, _d in enumerate(SCAN_SHIFTS):
    for _r in range(BT):
        if (_r % T) >= _d:
            SCAN_S[_i, _r, _r - _d] = 1.0      # source row is in the same segment
        else:
            SCAN_F[_i, _r, :] = 1.0            # keep state: multiply 'a' by 1, add 0 to h


# ---- in-kernel helpers ---------------------------------------------------------------
def _mxu(a, w_bf16):
    """bf16-input MXU matmul with f32 accumulation (no Precision.HIGHEST)."""
    return jnp.dot(a.astype(jnp.bfloat16), w_bf16, preferred_element_type=jnp.float32)


def _gelu_tanh(x):
    # tanh-form GELU (one EUP tanh + a handful of VPU ops); deviates from the exact
    # erf nn.GELU() by <~1e-3 absolute — well inside the test tolerance.
    return 0.5 * x * (1.0 + jnp.tanh(_SQRT_2_OVER_PI * (x + 0.044715 * x * x * x)))


def _sigmoid(x):
    return 1.0 / (1.0 + jnp.exp(-x))


def _rmsnorm(x, w):
    ms = jnp.mean(x * x, axis=-1, keepdims=True)
    return x * jax.lax.rsqrt(ms + RMS_EPS) * w


# ---- fused Residual_block kernel -----------------------------------------------------
def residual_block_kernel(x_ref, rmsw_ref,
                          w12_ref, b12_ref, wc_ref, bc_ref,
                          wax_ref, bax_ref, c_ref, wp3_ref, bp3_ref,
                          wm12_ref, bm12_ref, wm3_ref, bm3_ref,
                          ss_ref, sf_ref,
                          o_ref):
    x = x_ref[...]                    # (BT, D) f32, row r = b*T + t
    rms_w = rmsw_ref[...]             # (1, D)

    # ---------------- x1 = RMSNorm(x); x1 = Recurrent_block(x1) ----------------
    xn = _rmsnorm(x, rms_w)

    # fused p1|p2 projection: one lane-dense (BT,128)x(128,256) matmul, bias added once
    u12 = _mxu(xn, w12_ref[...]) + b12_ref[...]                   # (BT, 2D)
    u1 = _gelu_tanh(u12[:, :D])                                   # gelu(p1(x))
    u2 = u12[:, D:]                                               # p2(x)

    # Temporal_Conv1D(kernel_size=1, stride=1) + ReLU == pointwise linear + ReLU
    v = jnp.maximum(_mxu(u2, wc_ref[...]) + bc_ref[...], 0.0)     # (BT, D)

    # RG-LRU gates for ALL timesteps at once (fused Wa|Wx matmul)
    rx = _mxu(v, wax_ref[...]) + bax_ref[...]                     # (BT, 2D)
    r_gate = _sigmoid(rx[:, :D])
    i_gate = _sigmoid(rx[:, D:])
    a_gate = jnp.exp(c_ref[...] * r_gate)                         # c = -C*softplus(-Lambda)
    g_in = jnp.sqrt(jnp.maximum(1.0 - a_gate * a_gate, 0.0)) * (i_gate * v)

    # Segmented Hillis–Steele scan: h_t = a_t*h_{t-1} + g_t in log2(T)=3 full-vreg
    # steps. Shift-by-d is a tiny constant 0/1 matmul on the idle MXU (segment resets
    # across batches baked into the matrix); no scratch buffer, no serial loop.
    A = a_gate                                                    # cumulative 'a'
    H = g_in                                                      # running h
    for i in range(NSTEPS):
        S = ss_ref[i]                                             # (BT, BT)
        f = sf_ref[i]                                             # (BT, D)
        h_prev = jnp.dot(S, H, preferred_element_type=jnp.float32)   # 0 at invalid rows
        a_prev = jnp.dot(S, A, preferred_element_type=jnp.float32) + f  # 1 at invalid rows
        H = H + A * h_prev
        A = A * a_prev
    y_rnn = H                                                     # (BT, D)

    xr = x + _mxu(u1 * y_rnn, wp3_ref[...]) + bp3_ref[...]        # p3 + first residual

    # ---------------- x2 = RMSNorm(x); x2 = Gated_MLP_block(x2) ----------------
    xn2 = _rmsnorm(xr, rms_w)
    m12 = _mxu(xn2, wm12_ref[...]) + bm12_ref[...]                # (BT, 2*3D) = (BT, 768)
    gated = _gelu_tanh(m12[:, :DM]) * m12[:, DM:]
    mlp = _mxu(gated, wm3_ref[...]) + bm3_ref[...]                # (BT, D)

    o_ref[...] = xr + mlp                                         # second residual


# ---- wrapper --------------------------------------------------------------------------
@jax.jit
def residual_block_forward(x, packed):
    (rms_w, w12, b12, wc, bc, wax, bax, c_row,
     wp3, bp3, wm12, bm12, wm3, bm3) = packed
    x2d = x.reshape(BT, D)            # contiguous (B,T)->(B*T) merge: free, no transpose
    args = (x2d, rms_w, w12, b12, wc, bc, wax, bax, c_row,
            wp3, bp3, wm12, bm12, wm3, bm3,
            jnp.asarray(SCAN_S), jnp.asarray(SCAN_F))
    # No grid: single invocation, every operand fully VMEM-resident and single-buffered
    # (no pointless second weight buffer); total footprint well under 1 MiB.
    out = pl.pallas_call(
        residual_block_kernel,
        out_shape=jax.ShapeDtypeStruct((BT, D), jnp.float32),
        in_specs=[pl.BlockSpec(memory_space=pltpu.MemorySpace.VMEM) for _ in args],
        out_specs=pl.BlockSpec(memory_space=pltpu.MemorySpace.VMEM),
    )(*args)
    return out.reshape(B, T, D)


def pack_params(p):
    """One-time packing (outside the hot path) into the kernel's fused bf16 layout."""
    (w_p1, b_p1, w_p2, b_p2, w_conv, b_conv, wa, ba, wx, bx, lmb,
     w_p3, b_p3, w_m1, b_m1, w_m2, b_m2, w_m3, b_m3, rms_w) = p
    bf = jnp.bfloat16
    row = lambda v: v.reshape(1, -1).astype(jnp.float32)
    # precompute the RG-LRU constant with the numerically stable softplus
    c_row = row(-RGLRU_C * jax.nn.softplus(-lmb))
    return (row(rms_w),
            jnp.concatenate([w_p1, w_p2], axis=1).astype(bf),   # (D, 2D)
            row(jnp.concatenate([b_p1, b_p2])),
            w_conv.astype(bf), row(b_conv),
            jnp.concatenate([wa, wx], axis=1).astype(bf),       # (D, 2D)
            row(jnp.concatenate([ba, bx])),
            c_row,
            w_p3.astype(bf), row(b_p3),
            jnp.concatenate([w_m1, w_m2], axis=1).astype(bf),   # (D, 6D)
            row(jnp.concatenate([b_m1, b_m2])),
            w_m3.astype(bf), row(b_m3))


# ---- pure-JAX reference (mirrors the PyTorch forward) ---------------------------------
# Matmuls use bf16 inputs + f32 accumulation, matching the kernel's MXU-native path
# (standard TPU practice; everything else is f32). GELU here is the exact erf form.
def reference_forward(x, p):
    (w_p1, b_p1, w_p2, b_p2, w_conv, b_conv, wa, ba, wx, bx, lmb,
     w_p3, b_p3, w_m1, b_m1, w_m2, b_m2, w_m3, b_m3, rms_w) = p

    def bdot(a, w):
        return jnp.dot(a.astype(jnp.bfloat16), w.astype(jnp.bfloat16),
                       preferred_element_type=jnp.float32)

    def rmsnorm(v):
        return v * jax.lax.rsqrt(jnp.mean(v * v, axis=-1, keepdims=True) + RMS_EPS) * rms_w

    def gelu(v):                                  # exact nn.GELU()
        return 0.5 * v * (1.0 + jax.lax.erf(v * _INV_SQRT2))

    # ---- Recurrent_block (self.tmb) ----
    xn = rmsnorm(x)
    x1 = gelu(bdot(xn, w_p1) + b_p1)
    x2 = bdot(xn, w_p2) + b_p2
    x2 = jnp.maximum(bdot(x2, w_conv) + b_conv, 0.0)       # Temporal_Conv1D(k=1) + ReLU
    sp = jax.nn.softplus(-lmb)                             # F.softplus(-Lambda)
    ht = jnp.zeros((x.shape[0], D), jnp.float32)
    ys = []
    for t in range(x.shape[1]):                            # RG-LRU .foresee
        xt = x2[:, t, :]
        rt = jax.nn.sigmoid(bdot(xt, wa) + ba)
        it = jax.nn.sigmoid(bdot(xt, wx) + bx)
        at = jnp.exp(-RGLRU_C * sp * rt)
        ht = at * ht + jnp.sqrt(1.0 - at * at) * (it * xt)
        ys.append(ht[:, None, :])
    x2 = jnp.concatenate(ys, axis=1)
    xr = x + (bdot(x1 * x2, w_p3) + b_p3)                  # first residual

    # ---- Gated_MLP_block (self.mlp) ----
    xn2 = rmsnorm(xr)
    m1 = gelu(bdot(xn2, w_m1) + b_m1)
    m2 = bdot(xn2, w_m2) + b_m2
    return xr + (bdot(m1 * m2, w_m3) + b_m3)               # second residual


if __name__ == "__main__":
    key = jax.random.PRNGKey(0)
    ks = jax.random.split(key, 20)

    def w_init(k, fan_in, fan_out):
        return jax.random.normal(k, (fan_in, fan_out), jnp.float32) / jnp.sqrt(float(fan_in))

    def b_init(k, n):
        return 0.02 * jax.random.normal(k, (n,), jnp.float32)

    x = jax.random.normal(ks[0], (B, T, D), dtype=jnp.float32)

    # All weights stored as (in_features, out_features) == PyTorch weight.T (equivalent
    # parameterization; forward semantics unchanged).
    w_p1, b_p1 = w_init(ks[1], D, D), b_init(ks[2], D)
    w_p2, b_p2 = w_init(ks[3], D, D), b_init(ks[4], D)
    w_conv, b_conv = w_init(ks[5], D, D), b_init(ks[6], D)          # Conv1d(k=1) pointwise
    wa = w_init(ks[7], D, D)                                        # N(0, 1/sqrt(dim))
    wx = w_init(ks[8], D, D)
    ba = jnp.zeros((D,), jnp.float32)
    bx = jnp.zeros((D,), jnp.float32)
    lam = jax.random.uniform(ks[9], (D,), jnp.float32, minval=0.9, maxval=0.999)
    lmb = -jnp.log(lam ** (-1.0 / RGLRU_C) - 1.0)                   # reset_parameters reparam
    w_p3, b_p3 = w_init(ks[10], D, D), b_init(ks[11], D)
    w_m1, b_m1 = w_init(ks[12], D, DM), b_init(ks[13], DM)
    w_m2, b_m2 = w_init(ks[14], D, DM), b_init(ks[15], DM)
    w_m3, b_m3 = w_init(ks[16], DM, D), b_init(ks[17], D)
    rms_w = jnp.ones((D,), jnp.float32)                             # RMSNorm default weight

    raw = (w_p1, b_p1, w_p2, b_p2, w_conv, b_conv, wa, ba, wx, bx, lmb,
           w_p3, b_p3, w_m1, b_m1, w_m2, b_m2, w_m3, b_m3, rms_w)
    packed = pack_params(raw)

    out = jax.block_until_ready(residual_block_forward(x, packed))
    ref = reference_forward(x, raw)

    assert out.shape == (B, T, D), out.shape
    # 3e-2 tolerance: covers the tanh-GELU approximation (~1e-3/elem) and bf16 MXU paths.
    assert jnp.allclose(out, ref, atol=3e-2, rtol=3e-2), float(jnp.max(jnp.abs(out - ref)))
    print("KERNEL_OK")
</pallas_src>

<mosaic_0001>
module attributes {stable_mosaic.version = 11 : i64} {
  func.func @residual_block_kernel(%arg0: memref<16x128xf32, #tpu.memory_space<vmem>>, %arg1: memref<1x128xf32, #tpu.memory_space<vmem>>, %arg2: memref<128x256xbf16, #tpu.memory_space<vmem>>, %arg3: memref<1x256xf32, #tpu.memory_space<vmem>>, %arg4: memref<128x128xbf16, #tpu.memory_space<vmem>>, %arg5: memref<1x128xf32, #tpu.memory_space<vmem>>, %arg6: memref<128x256xbf16, #tpu.memory_space<vmem>>, %arg7: memref<1x256xf32, #tpu.memory_space<vmem>>, %arg8: memref<1x128xf32, #tpu.memory_space<vmem>>, %arg9: memref<128x128xbf16, #tpu.memory_space<vmem>>, %arg10: memref<1x128xf32, #tpu.memory_space<vmem>>, %arg11: memref<128x768xbf16, #tpu.memory_space<vmem>>, %arg12: memref<1x768xf32, #tpu.memory_space<vmem>>, %arg13: memref<384x128xbf16, #tpu.memory_space<vmem>>, %arg14: memref<1x128xf32, #tpu.memory_space<vmem>>, %arg15: memref<3x16x16xf32, #tpu.memory_space<vmem>>, %arg16: memref<3x16x128xf32, #tpu.memory_space<vmem>>, %arg17: memref<16x128xf32, #tpu.memory_space<vmem>>) attributes {dimension_semantics = [], scalar_prefetch = 0 : i64, scratch_operands = 0 : i64, tpu.core_type = #tpu.core_type<tc>} {
    %c0 = arith.constant 0 : index
    %c0_0 = arith.constant 0 : index
    %0 = vector.load %arg0[%c0, %c0_0] : memref<16x128xf32, #tpu.memory_space<vmem>>, vector<16x128xf32>
    %c0_1 = arith.constant 0 : index
    %c0_2 = arith.constant 0 : index
    %1 = vector.load %arg1[%c0_1, %c0_2] : memref<1x128xf32, #tpu.memory_space<vmem>>, vector<1x128xf32>
    %2 = arith.mulf %0, %0 : vector<16x128xf32>
    %cst = arith.constant dense<0.000000e+00> : vector<16xf32>
    %3 = vector.multi_reduction <add>, %2, %cst [1] : vector<16x128xf32> to vector<16xf32>
    %4 = vector.shape_cast %3 : vector<16xf32> to vector<16x1xf32>
    %cst_3 = arith.constant 1.280000e+02 : f32
    %5 = vector.broadcast %cst_3 : f32 to vector<16x1xf32>
    %6 = arith.divf %4, %5 : vector<16x1xf32>
    %cst_4 = arith.constant 9.99999993E-9 : f32
    %7 = vector.broadcast %cst_4 : f32 to vector<16x1xf32>
    %8 = arith.addf %6, %7 : vector<16x1xf32>
    %9 = math.rsqrt %8 : vector<16x1xf32>
    %10 = vector.broadcast %9 : vector<16x1xf32> to vector<16x128xf32>
    %11 = arith.mulf %0, %10 : vector<16x128xf32>
    %12 = vector.broadcast %1 : vector<1x128xf32> to vector<16x128xf32>
    %13 = arith.mulf %11, %12 : vector<16x128xf32>
    %c0_5 = arith.constant 0 : index
    %c0_6 = arith.constant 0 : index
    %14 = vector.load %arg2[%c0_5, %c0_6] : memref<128x256xbf16, #tpu.memory_space<vmem>>, vector<128x256xbf16>
    %15 = arith.truncf %13 : vector<16x128xf32> to vector<16x128xbf16>
    %cst_7 = arith.constant dense<0.000000e+00> : vector<16x256xf32>
    %16 = tpu.matmul %15, %14, %cst_7 {dimension_numbers = #tpu.dot_dimension_numbers<[1], [0], [0], [1], [0, 0, 1, 1], [], []>} : vector<16x128xbf16>, vector<128x256xbf16>, vector<16x256xf32> -> vector<16x256xf32>
    %c0_8 = arith.constant 0 : index
    %c0_9 = arith.constant 0 : index
    %17 = vector.load %arg3[%c0_8, %c0_9] : memref<1x256xf32, #tpu.memory_space<vmem>>, vector<1x256xf32>
    %18 = vector.broadcast %17 : vector<1x256xf32> to vector<16x256xf32>
    %19 = arith.addf %16, %18 : vector<16x256xf32>
    %20 = vector.extract_strided_slice %19 {offsets = [0, 0], sizes = [16, 128], strides = [1, 1]} : vector<16x256xf32> to vector<16x128xf32>
    %cst_10 = arith.constant 5.000000e-01 : f32
    %21 = vector.broadcast %cst_10 : f32 to vector<16x128xf32>
    %22 = arith.mulf %21, %20 : vector<16x128xf32>
    %cst_11 = arith.constant 4.471500e-02 : f32
    %23 = vector.broadcast %cst_11 : f32 to vector<16x128xf32>
    %24 = arith.mulf %23, %20 : vector<16x128xf32>
    %25 = arith.mulf %24, %20 : vector<16x128xf32>
    %26 = arith.mulf %25, %20 : vector<16x128xf32>
    %27 = arith.addf %20, %26 : vector<16x128xf32>
    %cst_12 = arith.constant 0.797884583 : f32
    %28 = vector.broadcast %cst_12 : f32 to vector<16x128xf32>
    %29 = arith.mulf %28, %27 : vector<16x128xf32>
    %30 = math.tanh %29 : vector<16x128xf32>
    %cst_13 = arith.constant 1.000000e+00 : f32
    %31 = vector.broadcast %cst_13 : f32 to vector<16x128xf32>
    %32 = arith.addf %31, %30 : vector<16x128xf32>
    %33 = arith.mulf %22, %32 : vector<16x128xf32>
    %34 = vector.extract_strided_slice %19 {offsets = [0, 128], sizes = [16, 128], strides = [1, 1]} : vector<16x256xf32> to vector<16x128xf32>
    %c0_14 = arith.constant 0 : index
    %c0_15 = arith.constant 0 : index
    %35 = vector.load %arg4[%c0_14, %c0_15] : memref<128x128xbf16, #tpu.memory_space<vmem>>, vector<128x128xbf16>
    %36 = arith.truncf %34 : vector<16x128xf32> to vector<16x128xbf16>
    %cst_16 = arith.constant dense<0.000000e+00> : vector<16x128xf32>
    %37 = tpu.matmul %36, %35, %cst_16 {dimension_numbers = #tpu.dot_dimension_numbers<[1], [0], [0], [1], [0, 0, 1, 1], [], []>} : vector<16x128xbf16>, vector<128x128xbf16>, vector<16x128xf32> -> vector<16x128xf32>
    %c0_17 = arith.constant 0 : index
    %c0_18 = arith.constant 0 : index
    %38 = vector.load %arg5[%c0_17, %c0_18] : memref<1x128xf32, #tpu.memory_space<vmem>>, vector<1x128xf32>
    %39 = vector.broadcast %38 : vector<1x128xf32> to vector<16x128xf32>
    %40 = arith.addf %37, %39 : vector<16x128xf32>
    %cst_19 = arith.constant 0.000000e+00 : f32
    %41 = vector.broadcast %cst_19 : f32 to vector<16x128xf32>
    %42 = arith.maximumf %40, %41 : vector<16x128xf32>
    %c0_20 = arith.constant 0 : index
    %c0_21 = arith.constant 0 : index
    %43 = vector.load %arg6[%c0_20, %c0_21] : memref<128x256xbf16, #tpu.memory_space<vmem>>, vector<128x256xbf16>
    %44 = arith.truncf %42 : vector<16x128xf32> to vector<16x128xbf16>
    %cst_22 = arith.constant dense<0.000000e+00> : vector<16x256xf32>
    %45 = tpu.matmul %44, %43, %cst_22 {dimension_numbers = #tpu.dot_dimension_numbers<[1], [0], [0], [1], [0, 0, 1, 1], [], []>} : vector<16x128xbf16>, vector<128x256xbf16>, vector<16x256xf32> -> vector<16x256xf32>
    %c0_23 = arith.constant 0 : index
    %c0_24 = arith.constant 0 : index
    %46 = vector.load %arg7[%c0_23, %c0_24] : memref<1x256xf32, #tpu.memory_space<vmem>>, vector<1x256xf32>
    %47 = vector.broadcast %46 : vector<1x256xf32> to vector<16x256xf32>
    %48 = arith.addf %45, %47 : vector<16x256xf32>
    %49 = vector.extract_strided_slice %48 {offsets = [0, 0], sizes = [16, 128], strides = [1, 1]} : vector<16x256xf32> to vector<16x128xf32>
    %cst_25 = arith.constant 0.000000e+00 : f32
    %50 = vector.broadcast %cst_25 : f32 to vector<16x128xf32>
    %51 = arith.subf %50, %49 : vector<16x128xf32>
    %52 = math.exp %51 : vector<16x128xf32>
    %cst_26 = arith.constant 1.000000e+00 : f32
    %53 = vector.broadcast %cst_26 : f32 to vector<16x128xf32>
    %54 = arith.addf %53, %52 : vector<16x128xf32>
    %cst_27 = arith.constant 1.000000e+00 : f32
    %55 = vector.broadcast %cst_27 : f32 to vector<16x128xf32>
    %56 = arith.divf %55, %54 : vector<16x128xf32>
    %57 = vector.extract_strided_slice %48 {offsets = [0, 128], sizes = [16, 128], strides = [1, 1]} : vector<16x256xf32> to vector<16x128xf32>
    %cst_28 = arith.constant 0.000000e+00 : f32
    %58 = vector.broadcast %cst_28 : f32 to vector<16x128xf32>
    %59 = arith.subf %58, %57 : vector<16x128xf32>
    %60 = math.exp %59 : vector<16x128xf32>
    %cst_29 = arith.constant 1.000000e+00 : f32
    %61 = vector.broadcast %cst_29 : f32 to vector<16x128xf32>
    %62 = arith.addf %61, %60 : vector<16x128xf32>
    %cst_30 = arith.constant 1.000000e+00 : f32
    %63 = vector.broadcast %cst_30 : f32 to vector<16x128xf32>
    %64 = arith.divf %63, %62 : vector<16x128xf32>
    %c0_31 = arith.constant 0 : index
    %c0_32 = arith.constant 0 : index
    %65 = vector.load %arg8[%c0_31, %c0_32] : memref<1x128xf32, #tpu.memory_space<vmem>>, vector<1x128xf32>
    %66 = vector.broadcast %65 : vector<1x128xf32> to vector<16x128xf32>
    %67 = arith.mulf %66, %56 : vector<16x128xf32>
    %68 = math.exp %67 : vector<16x128xf32>
    %69 = arith.mulf %68, %68 : vector<16x128xf32>
    %cst_33 = arith.constant 1.000000e+00 : f32
    %70 = vector.broadcast %cst_33 : f32 to vector<16x128xf32>
    %71 = arith.subf %70, %69 : vector<16x128xf32>
    %cst_34 = arith.constant 0.000000e+00 : f32
    %72 = vector.broadcast %cst_34 : f32 to vector<16x128xf32>
    %73 = arith.maximumf %71, %72 : vector<16x128xf32>
    %74 = math.sqrt %73 : vector<16x128xf32>
    %75 = arith.mulf %64, %42 : vector<16x128xf32>
    %76 = arith.mulf %74, %75 : vector<16x128xf32>
    %c0_35 = arith.constant 0 : index
    %c0_36 = arith.constant 0 : index
    %c0_37 = arith.constant 0 : index
    %77 = vector.load %arg15[%c0_35, %c0_36, %c0_37] : memref<3x16x16xf32, #tpu.memory_space<vmem>>, vector<1x16x16xf32>
    %78 = vector.shape_cast %77 : vector<1x16x16xf32> to vector<16x16xf32>
    %c0_38 = arith.constant 0 : index
    %c0_39 = arith.constant 0 : index
    %c0_40 = arith.constant 0 : index
    %79 = vector.load %arg16[%c0_38, %c0_39, %c0_40] : memref<3x16x128xf32, #tpu.memory_space<vmem>>, vector<1x16x128xf32>
    %80 = vector.shape_cast %79 : vector<1x16x128xf32> to vector<16x128xf32>
    %cst_41 = arith.constant dense<0.000000e+00> : vector<16x128xf32>
    %81 = tpu.matmul %78, %76, %cst_41 {dimension_numbers = #tpu.dot_dimension_numbers<[1], [0], [0], [1], [0, 0, 1, 1], [], []>} : vector<16x16xf32>, vector<16x128xf32>, vector<16x128xf32> -> vector<16x128xf32>
    %cst_42 = arith.constant dense<0.000000e+00> : vector<16x128xf32>
    %82 = tpu.matmul %78, %68, %cst_42 {dimension_numbers = #tpu.dot_dimension_numbers<[1], [0], [0], [1], [0, 0, 1, 1], [], []>} : vector<16x16xf32>, vector<16x128xf32>, vector<16x128xf32> -> vector<16x128xf32>
    %83 = arith.addf %82, %80 : vector<16x128xf32>
    %84 = arith.mulf %68, %81 : vector<16x128xf32>
    %85 = arith.addf %76, %84 : vector<16x128xf32>
    %86 = arith.mulf %68, %83 : vector<16x128xf32>
    %c1 = arith.constant 1 : index
    %c0_43 = arith.constant 0 : index
    %c0_44 = arith.constant 0 : index
    %87 = vector.load %arg15[%c1, %c0_43, %c0_44] : memref<3x16x16xf32, #tpu.memory_space<vmem>>, vector<1x16x16xf32>
    %88 = vector.shape_cast %87 : vector<1x16x16xf32> to vector<16x16xf32>
    %c1_45 = arith.constant 1 : index
    %c0_46 = arith.constant 0 : index
    %c0_47 = arith.constant 0 : index
    %89 = vector.load %arg16[%c1_45, %c0_46, %c0_47] : memref<3x16x128xf32, #tpu.memory_space<vmem>>, vector<1x16x128xf32>
    %90 = vector.shape_cast %89 : vector<1x16x128xf32> to vector<16x128xf32>
    %cst_48 = arith.constant dense<0.000000e+00> : vector<16x128xf32>
    %91 = tpu.matmul %88, %85, %cst_48 {dimension_numbers = #tpu.dot_dimension_numbers<[1], [0], [0], [1], [0, 0, 1, 1], [], []>} : vector<16x16xf32>, vector<16x128xf32>, vector<16x128xf32> -> vector<16x128xf32>
    %cst_49 = arith.constant dense<0.000000e+00> : vector<16x128xf32>
    %92 = tpu.matmul %88, %86, %cst_49 {dimension_numbers = #tpu.dot_dimension_numbers<[1], [0], [0], [1], [0, 0, 1, 1], [], []>} : vector<16x16xf32>, vector<16x128xf32>, vector<16x128xf32> -> vector<16x128xf32>
    %93 = arith.addf %92, %90 : vector<16x128xf32>
    %94 = arith.mulf %86, %91 : vector<16x128xf32>
    %95 = arith.addf %85, %94 : vector<16x128xf32>
    %96 = arith.mulf %86, %93 : vector<16x128xf32>
    %c2 = arith.constant 2 : index
    %c0_50 = arith.constant 0 : index
    %c0_51 = arith.constant 0 : index
    %97 = vector.load %arg15[%c2, %c0_50, %c0_51] : memref<3x16x16xf32, #tpu.memory_space<vmem>>, vector<1x16x16xf32>
    %98 = vector.shape_cast %97 : vector<1x16x16xf32> to vector<16x16xf32>
    %cst_52 = arith.constant dense<0.000000e+00> : vector<16x128xf32>
    %99 = tpu.matmul %98, %95, %cst_52 {dimension_numbers = #tpu.dot_dimension_numbers<[1], [0], [0], [1], [0, 0, 1, 1], [], []>} : vector<16x16xf32>, vector<16x128xf32>, vector<16x128xf32> -> vector<16x128xf32>
    %100 = arith.mulf %96, %99 : vector<16x128xf32>
    %101 = arith.addf %95, %100 : vector<16x128xf32>
    %102 = arith.mulf %33, %101 : vector<16x128xf32>
    %c0_53 = arith.constant 0 : index
    %c0_54 = arith.constant 0 : index
    %103 = vector.load %arg9[%c0_53, %c0_54] : memref<128x128xbf16, #tpu.memory_space<vmem>>, vector<128x128xbf16>
    %104 = arith.truncf %102 : vector<16x128xf32> to vector<16x128xbf16>
    %cst_55 = arith.constant dense<0.000000e+00> : vector<16x128xf32>
    %105 = tpu.matmul %104, %103, %cst_55 {dimension_numbers = #tpu.dot_dimension_numbers<[1], [0], [0], [1], [0, 0, 1, 1], [], []>} : vector<16x128xbf16>, vector<128x128xbf16>, vector<16x128xf32> -> vector<16x128xf32>
    %106 = arith.addf %0, %105 : vector<16x128xf32>
    %c0_56 = arith.constant 0 : index
    %c0_57 = arith.constant 0 : index
    %107 = vector.load %arg10[%c0_56, %c0_57] : memref<1x128xf32, #tpu.memory_space<vmem>>, vector<1x128xf32>
    %108 = vector.broadcast %107 : vector<1x128xf32> to vector<16x128xf32>
    %109 = arith.addf %106, %108 : vector<16x128xf32>
    %110 = arith.mulf %109, %109 : vector<16x128xf32>
    %cst_58 = arith.constant dense<0.000000e+00> : vector<16xf32>
    %111 = vector.multi_reduction <add>, %110, %cst_58 [1] : vector<16x128xf32> to vector<16xf32>
    %112 = vector.shape_cast %111 : vector<16xf32> to vector<16x1xf32>
    %cst_59 = arith.constant 1.280000e+02 : f32
    %113 = vector.broadcast %cst_59 : f32 to vector<16x1xf32>
    %114 = arith.divf %112, %113 : vector<16x1xf32>
    %cst_60 = arith.constant 9.99999993E-9 : f32
    %115 = vector.broadcast %cst_60 : f32 to vector<16x1xf32>
    %116 = arith.addf %114, %115 : vector<16x1xf32>
    %117 = math.rsqrt %116 : vector<16x1xf32>
    %118 = vector.broadcast %117 : vector<16x1xf32> to vector<16x128xf32>
    %119 = arith.mulf %109, %118 : vector<16x128xf32>
    %120 = vector.broadcast %1 : vector<1x128xf32> to vector<16x128xf32>
    %121 = arith.mulf %119, %120 : vector<16x128xf32>
    %c0_61 = arith.constant 0 : index
    %c0_62 = arith.constant 0 : index
    %122 = vector.load %arg11[%c0_61, %c0_62] : memref<128x768xbf16, #tpu.memory_space<vmem>>, vector<128x768xbf16>
    %123 = arith.truncf %121 : vector<16x128xf32> to vector<16x128xbf16>
    %cst_63 = arith.constant dense<0.000000e+00> : vector<16x768xf32>
    %124 = tpu.matmul %123, %122, %cst_63 {dimension_numbers = #tpu.dot_dimension_numbers<[1], [0], [0], [1], [0, 0, 1, 1], [], []>} : vector<16x128xbf16>, vector<128x768xbf16>, vector<16x768xf32> -> vector<16x768xf32>
    %c0_64 = arith.constant 0 : index
    %c0_65 = arith.constant 0 : index
    %125 = vector.load %arg12[%c0_64, %c0_65] : memref<1x768xf32, #tpu.memory_space<vmem>>, vector<1x768xf32>
    %126 = vector.broadcast %125 : vector<1x768xf32> to vector<16x768xf32>
    %127 = arith.addf %124, %126 : vector<16x768xf32>
    %128 = vector.extract_strided_slice %127 {offsets = [0, 0], sizes = [16, 384], strides = [1, 1]} : vector<16x768xf32> to vector<16x384xf32>
    %cst_66 = arith.constant 5.000000e-01 : f32
    %129 = vector.broadcast %cst_66 : f32 to vector<16x384xf32>
    %130 = arith.mulf %129, %128 : vector<16x384xf32>
    %cst_67 = arith.constant 4.471500e-02 : f32
    %131 = vector.broadcast %cst_67 : f32 to vector<16x384xf32>
    %132 = arith.mulf %131, %128 : vector<16x384xf32>
    %133 = arith.mulf %132, %128 : vector<16x384xf32>
    %134 = arith.mulf %133, %128 : vector<16x384xf32>
    %135 = arith.addf %128, %134 : vector<16x384xf32>
    %cst_68 = arith.constant 0.797884583 : f32
    %136 = vector.broadcast %cst_68 : f32 to vector<16x384xf32>
    %137 = arith.mulf %136, %135 : vector<16x384xf32>
    %138 = math.tanh %137 : vector<16x384xf32>
    %cst_69 = arith.constant 1.000000e+00 : f32
    %139 = vector.broadcast %cst_69 : f32 to vector<16x384xf32>
    %140 = arith.addf %139, %138 : vector<16x384xf32>
    %141 = arith.mulf %130, %140 : vector<16x384xf32>
    %142 = vector.extract_strided_slice %127 {offsets = [0, 384], sizes = [16, 384], strides = [1, 1]} : vector<16x768xf32> to vector<16x384xf32>
    %143 = arith.mulf %141, %142 : vector<16x384xf32>
    %c0_70 = arith.constant 0 : index
    %c0_71 = arith.constant 0 : index
    %144 = vector.load %arg13[%c0_70, %c0_71] : memref<384x128xbf16, #tpu.memory_space<vmem>>, vector<384x128xbf16>
    %145 = arith.truncf %143 : vector<16x384xf32> to vector<16x384xbf16>
    %cst_72 = arith.constant dense<0.000000e+00> : vector<16x128xf32>
    %146 = tpu.matmul %145, %144, %cst_72 {dimension_numbers = #tpu.dot_dimension_numbers<[1], [0], [0], [1], [0, 0, 1, 1], [], []>} : vector<16x384xbf16>, vector<384x128xbf16>, vector<16x128xf32> -> vector<16x128xf32>
    %c0_73 = arith.constant 0 : index
    %c0_74 = arith.constant 0 : index
    %147 = vector.load %arg14[%c0_73, %c0_74] : memref<1x128xf32, #tpu.memory_space<vmem>>, vector<1x128xf32>
    %148 = vector.broadcast %147 : vector<1x128xf32> to vector<16x128xf32>
    %149 = arith.addf %146, %148 : vector<16x128xf32>
    %150 = arith.addf %109, %149 : vector<16x128xf32>
    %c0_75 = arith.constant 0 : index
    %c0_76 = arith.constant 0 : index
    %151 = vector.load %arg17[%c0_75, %c0_76] : memref<16x128xf32, #tpu.memory_space<vmem>>, vector<16x128xf32>
    tpu.vector_store %arg17[%c0_75, %c0_76], %150 {strides = array<i32>} : memref<16x128xf32, #tpu.memory_space<vmem>>, vector<16x128xf32>,
    return
  }
}

</mosaic_0001>

<bundles_post_ra>
// kernel: residual_block_forward.1
= control target key start
LH: loop header
LB: loop body
LE: loop exit
PB: predicated region body
PF: predicated region fallthrough
CT: control target
= control target key end

     0   :  { %s3283_s0 = inlined_call_operand.hbm [shape: f32[16,128], index: 0, kind: input, shape index: {}]   ;;  %s3284_s1 = inlined_call_operand.vmem [shape: f32[1,128], index: 1, kind: input, shape index: {}]   ;;  %s3285_s2 = inlined_call_operand.hbm [shape: bf16[128,256], index: 2, kind: input, shape index: {}]   ;;  %s3286_s3 = inlined_call_operand.vmem [shape: f32[1,256], index: 3, kind: input, shape index: {}]   ;;  %s3287_s4 = inlined_call_operand.hbm [shape: bf16[128,128], index: 4, kind: input, shape index: {}]   ;;  %s3288_s5 = inlined_call_operand.vmem [shape: f32[1,128], index: 5, kind: input, shape index: {}]   ;;  %s3289_s6 = inlined_call_operand.hbm [shape: bf16[128,256], index: 6, kind: input, shape index: {}]   ;;  %s3290_s7 = inlined_call_operand.vmem [shape: f32[1,256], index: 7, kind: input, shape index: {}]   ;;  %s3291_s8 = inlined_call_operand.vmem [shape: f32[1,128], index: 8, kind: input, shape index: {}]   ;;  %s3292_s9 = inlined_call_operand.hbm [shape: bf16[128,128], index: 9, kind: input, shape index: {}]   ;;  %s3293_s10 = inlined_call_operand.vmem [shape: f32[1,128], index: 10, kind: input, shape index: {}]   ;;  %s3294_s11 = inlined_call_operand.hbm [shape: bf16[128,768], index: 11, kind: input, shape index: {}]   ;;  %s3295_s12 = inlined_call_operand.vmem [shape: f32[1,768], index: 12, kind: input, shape index: {}]   ;;  %s3296_s13 = inlined_call_operand.hbm [shape: bf16[384,128], index: 13, kind: input, shape index: {}]   ;;  %s3297_s14 = inlined_call_operand.vmem [shape: f32[1,128], index: 14, kind: input, shape index: {}]   ;;  %s3298_s15 = inlined_call_operand.hbm [shape: f32[3,16,16], index: 15, kind: input, shape index: {}]   ;;  %s3299_s16 = inlined_call_operand.vmem [shape: f32[3,16,128], index: 16, kind: input, shape index: {}]   ;;  %s3300_s17 = inlined_call_operand.hbm [shape: f32[16,128], index: 17, kind: output, shape index: {}]  }
   0x1   :  { %3306 = sst [smem:[#allocation23_spill]] %s3283_s0 }
   0x2   :  { %3307 = sst [smem:[#allocation24_spill]] %s3284_s1 }
   0x3   :  { %22 = vsyncpa [#allocation3], 0 }
   0x4   :  { %23 = vsyncpa [#allocation6], 0 }
   0x5   :  { %24 = vsyncpa [#allocation9], 0 }
   0x6   :  { %25 = vsyncpa [#allocation12], 0 }
   0x7   :  { %26 = vsyncpa [#allocation15], 0 }
   0x8   :  { %27 = vsyncpa [#allocation4], 0  ;;  %s2827_s24 = smov [#allocation5]   ;;  %s2828_s26 = smov [#allocation8]  }
   0x9   :  { %s47_s25 = sshll.u32 %s2827_s24, 4  ;;  %s75_s27 = sshll.u32 %s2828_s26, 4  ;;  %s48_s25 = int_to_ptr.vmem [resolvable:$true] %s47_s25  ;;  %s2935_s27 = int_to_ptr.vmem [resolvable:$true] %s75_s27 }
   0xa   :  { %s2617_s0 = scalar_lea.hbm %s3285_s2, 2048 }
   0xb   :  { %p2618_p0 = scmp.ne.s32.totalorder %s3285_s2, %s2617_s0  ;;  %p2621_p1 = scmp.lt.u32.totalorder %s2617_s0, %s3285_s2 }
   0xd   :  { %p2623_p2 = pnand %p2621_p1, %p2618_p0 }
   0xf   :  { %2626 = shalt.err (!%p2623_p2)
}
  0x10   :  { %s2627_s20 = scalar_lea.vmem %s48_s25, 2048  ;;  %p2632_p4 = scmp.lt.s32.totalorder %s48_s25, %s48_s25 }
  0x11   :  { %p2628_p3 = scmp.ne.s32.totalorder %s48_s25, %s2627_s20  ;;  %p2633_p5 = scmp.lt.s32.totalorder %s2627_s20, %s2627_s20 }
  0x13   :  { %p2634_p6 = por %p2633_p5, %p2632_p4 }
  0x15   :  { %p2635_p7 = pnand %p2634_p6, %p2628_p3 }
  0x17   :  { %2638 = shalt.err (!%p2635_p7)
}
  0x18   :  { %s3302_s21 = smov 128   ;;  %s3304_s22 = smov 8  }
  0x19   :  { %53 = dma.hbm_to_vmem [thread:$0]  %s3285_s2, 2048, %s48_s25, [#allocation6], %s3302_s21, %s3302_s21, %s3304_s22  }
  0x1a   :  { %s2639_s29 = scalar_lea.hbm %s3289_s6, 2048 }
  0x1b   :  { %p2640_p8 = scmp.ne.s32.totalorder %s3289_s6, %s2639_s29  ;;  %p2643_p9 = scmp.lt.u32.totalorder %s2639_s29, %s3289_s6 }
  0x1d   :  { %p2645_p10 = pnand %p2643_p9, %p2640_p8 }
  0x1f   :  { %2648 = shalt.err (!%p2645_p10)
}
  0x20   :  { %s2649_s1 = scalar_lea.vmem %s2935_s27, 2048  ;;  %p2654_p12 = scmp.lt.s32.totalorder %s2935_s27, %s2935_s27 }
  0x21   :  { %p2650_p11 = scmp.ne.s32.totalorder %s2935_s27, %s2649_s1  ;;  %p2655_p13 = scmp.lt.s32.totalorder %s2649_s1, %s2649_s1 }
  0x23   :  { %p2656_p0 = por %p2655_p13, %p2654_p12 }
  0x25   :  { %p2657_p1 = pnand %p2656_p0, %p2650_p11 }
  0x27   :  { %2660 = shalt.err (!%p2657_p1)
}
  0x28   :  { %81 = dma.hbm_to_vmem [thread:$0]  %s3289_s6, 2048, %s2935_s27, [#allocation9], %s3302_s21, %s3302_s21, %s3304_s22  }
  0x29   :  { %s2831_s20 = smov [#allocation11]   ;;  %s2661_s28 = scalar_lea.hbm %s3294_s11, 6144 }
  0x2a   :  { %s105_s23 = sshll.u32 %s2831_s20, 4  ;;  %p2662_p2 = scmp.ne.s32.totalorder %s3294_s11, %s2661_s28  ;;  %s106_s23 = int_to_ptr.vmem [resolvable:$true] %s105_s23 }
  0x2b   :  { %p2665_p3 = scmp.lt.u32.totalorder %s2661_s28, %s3294_s11 }
  0x2d   :  { %p2667_p4 = pnand %p2665_p3, %p2662_p2 }
  0x2f   :  { %2670 = shalt.err (!%p2667_p4)
}
  0x30   :  { %s2671_s19 = scalar_lea.vmem %s106_s23, 6144  ;;  %p2676_p6 = scmp.lt.s32.totalorder %s106_s23, %s106_s23 }
  0x31   :  { %p2672_p5 = scmp.ne.s32.totalorder %s106_s23, %s2671_s19  ;;  %p2677_p7 = scmp.lt.s32.totalorder %s2671_s19, %s2671_s19 }
  0x33   :  { %p2678_p8 = por %p2677_p7, %p2676_p6 }
  0x35   :  { %p2679_p9 = pnand %p2678_p8, %p2672_p5 }
  0x37   :  { %2682 = shalt.err (!%p2679_p9)
}
  0x38   :  { %s2832_s6 = smov 384   ;;  %s2833_s27 = smov 24  }
  0x39   :  { %111 = dma.hbm_to_vmem [thread:$0]  %s3294_s11, 6144, %s106_s23, [#allocation12], %s2832_s6, %s2832_s6, %s2833_s27  }
  0x3a   :  { %s2834_s25 = smov [#allocation2]   ;;  %s2835_s24 = smov [#allocation7]  }
  0x3b   :  { %s33_s20 = sshll.u32 %s2834_s25, 4  ;;  %s61_s26 = sshll.u32 %s2835_s24, 4  ;;  %s34_s20 = int_to_ptr.vmem [resolvable:$true] %s33_s20  ;;  %s62_s26 = int_to_ptr.vmem [resolvable:$true] %s61_s26 }
  0x3c   :  { %s3308_s0 = sld [smem:[#allocation23_spill]] }
  0x42   :  { %s2683_s30 = scalar_lea.hbm %s3308_s0, 256 }
  0x43   :  { %p2684_p10 = scmp.ne.s32.totalorder %s3308_s0, %s2683_s30  ;;  %p2687_p11 = scmp.lt.u32.totalorder %s2683_s30, %s3308_s0 }
  0x45   :  { %p2689_p12 = pnand %p2687_p11, %p2684_p10 }
  0x47   :  { %2692 = shalt.err (!%p2689_p12)
}
  0x48   :  { %s2693_s11 = scalar_lea.vmem %s34_s20, 256  ;;  %p2698_p0 = scmp.lt.s32.totalorder %s34_s20, %s34_s20 }
  0x49   :  { %p2694_p13 = scmp.ne.s32.totalorder %s34_s20, %s2693_s11  ;;  %p2699_p1 = scmp.lt.s32.totalorder %s2693_s11, %s2693_s11 }
  0x4b   :  { %p2700_p2 = por %p2699_p1, %p2698_p0 }
  0x4d   :  { %p2701_p3 = pnand %p2700_p2, %p2694_p13 }
  0x4f   :  { %2704 = shalt.err (!%p2701_p3)
}
  0x50   :  { %s3309_s23 = smov 8   ;;  %s3310_s6 = smov 128  }
  0x51   :  { %39 = dma.hbm_to_vmem [thread:$0]  %s3308_s0, 256, %s34_s20, [#allocation3], %s3310_s6, %s3310_s6, %s3309_s23  }
  0x52   :  { %s2705_s22 = scalar_lea.hbm %s3287_s4, 1024 }
  0x53   :  { %p2706_p4 = scmp.ne.s32.totalorder %s3287_s4, %s2705_s22  ;;  %p2709_p5 = scmp.lt.u32.totalorder %s2705_s22, %s3287_s4 }
  0x55   :  { %p2711_p6 = pnand %p2709_p5, %p2706_p4 }
  0x57   :  { %2714 = shalt.err (!%p2711_p6)
}
  0x58   :  { %s2715_s30 = scalar_lea.vmem %s62_s26, 1024  ;;  %p2720_p8 = scmp.lt.s32.totalorder %s62_s26, %s62_s26 }
  0x59   :  { %p2716_p7 = scmp.ne.s32.totalorder %s62_s26, %s2715_s30  ;;  %p2721_p9 = scmp.lt.s32.totalorder %s2715_s30, %s2715_s30 }
  0x5b   :  { %p2722_p10 = por %p2721_p9, %p2720_p8 }
  0x5d   :  { %p2723_p11 = pnand %p2722_p10, %p2716_p7 }
  0x5f   :  { %2726 = shalt.err (!%p2723_p11)
}
  0x60   :  { %s2836_s20 = smov 64   ;;  %s2837_s0 = smov 4  }
  0x61   :  { %67 = dma.hbm_to_vmem [thread:$0]  %s3287_s4, 1024, %s62_s26, [#allocation6], %s2836_s20, %s2836_s20, %s2837_s0  }
  0x62   :  { %s2838_s11 = smov [#allocation10]   ;;  %s2839_s1 = smov [#allocation13]  }
  0x63   :  { %s91_s27 = sshll.u32 %s2838_s11, 4  ;;  %s119_s2 = sshll.u32 %s2839_s1, 4  ;;  %s92_s27 = int_to_ptr.vmem [resolvable:$true] %s91_s27  ;;  %s120_s2 = int_to_ptr.vmem [resolvable:$true] %s119_s2 }
  0x64   :  { %s2727_s25 = scalar_lea.hbm %s3292_s9, 1024 }
  0x65   :  { %p2728_p12 = scmp.ne.s32.totalorder %s3292_s9, %s2727_s25  ;;  %p2731_p13 = scmp.lt.u32.totalorder %s2727_s25, %s3292_s9 }
  0x67   :  { %p2733_p0 = pnand %p2731_p13, %p2728_p12 }
  0x69   :  { %2736 = shalt.err (!%p2733_p0)
}
  0x6a   :  { %s2737_s4 = scalar_lea.vmem %s92_s27, 1024  ;;  %p2742_p2 = scmp.lt.s32.totalorder %s92_s27, %s92_s27 }
  0x6b   :  { %p2738_p1 = scmp.ne.s32.totalorder %s92_s27, %s2737_s4  ;;  %p2743_p3 = scmp.lt.s32.totalorder %s2737_s4, %s2737_s4 }
  0x6d   :  { %p2744_p4 = por %p2743_p3, %p2742_p2 }
  0x6f   :  { %p2745_p5 = pnand %p2744_p4, %p2738_p1 }
  0x71   :  { %2748 = shalt.err (!%p2745_p5)
}
  0x72   :  { %97 = dma.hbm_to_vmem [thread:$0]  %s3292_s9, 1024, %s92_s27, [#allocation9], %s2836_s20, %s2836_s20, %s2837_s0  }
  0x73   :  { %s2749_s1 = scalar_lea.hbm %s3296_s13, 3072 }
  0x74   :  { %p2750_p6 = scmp.ne.s32.totalorder %s3296_s13, %s2749_s1  ;;  %p2753_p7 = scmp.lt.u32.totalorder %s2749_s1, %s3296_s13 }
  0x76   :  { %p2755_p8 = pnand %p2753_p7, %p2750_p6 }
  0x78   :  { %2758 = shalt.err (!%p2755_p8)
}
  0x79   :  { %s2759_s28 = scalar_lea.vmem %s120_s2, 3072  ;;  %p2764_p10 = scmp.lt.s32.totalorder %s120_s2, %s120_s2 }
  0x7a   :  { %p2760_p9 = scmp.ne.s32.totalorder %s120_s2, %s2759_s28  ;;  %p2765_p11 = scmp.lt.s32.totalorder %s2759_s28, %s2759_s28 }
  0x7c   :  { %p2766_p12 = por %p2765_p11, %p2764_p10 }
  0x7e   :  { %p2767_p13 = pnand %p2766_p12, %p2760_p9 }
  0x80   :  { %2770 = shalt.err (!%p2767_p13)
}
  0x81   :  { %125 = dma.hbm_to_vmem [thread:$0]  %s3296_s13, 3072, %s120_s2, [#allocation12], %s2836_s20, %s2836_s20, %s2837_s0  }
  0x82   :  { %s2840_s29 = smov [#allocation14]   ;;  %s2771_s18 = scalar_lea.hbm %s3298_s15, 768 }
  0x83   :  { %s133_s30 = sshll.u32 %s2840_s29, 4  ;;  %p2772_p0 = scmp.ne.s32.totalorder %s3298_s15, %s2771_s18  ;;  %s134_s30 = int_to_ptr.vmem [resolvable:$true] %s133_s30 }
  0x84   :  { %p2775_p1 = scmp.lt.u32.totalorder %s2771_s18, %s3298_s15 }
  0x86   :  { %p2777_p2 = pnand %p2775_p1, %p2772_p0 }
  0x88   :  { %2780 = shalt.err (!%p2777_p2)
}
  0x89   :  { %s2781_s22 = scalar_lea.vmem %s134_s30, 768  ;;  %p2786_p4 = scmp.lt.s32.totalorder %s134_s30, %s134_s30 }
  0x8a   :  { %p2782_p3 = scmp.ne.s32.totalorder %s134_s30, %s2781_s22  ;;  %p2787_p5 = scmp.lt.s32.totalorder %s2781_s22, %s2781_s22 }
  0x8c   :  { %p2788_p6 = por %p2787_p5, %p2786_p4 }
  0x8e   :  { %p2789_p7 = pnand %p2788_p6, %p2782_p3 }
  0x90   :  { %2792 = shalt.err (!%p2789_p7)
}
  0x91   :  { %139 = dma.hbm_to_vmem [thread:$0]  %s3298_s15, 768, %s134_s30, [#allocation15], %s3310_s6, %s3310_s6, %s3309_s23  }
  0x92   :  { %2815 = dma.done.wait [#allocation3], 256  }
  0x93   :  { %2816 = vsyncadd [#allocation3], 4294967040 }
  0x94   :  { %2817 = dma.done.wait [#allocation6], 3072  }
  0x95   :  { %2818 = vsyncadd [#allocation6], 4294964224 }
  0x96   :  { %2819 = dma.done.wait [#allocation9], 3072  }
  0x97   :  { %2820 = vsyncadd [#allocation9], 4294964224 }
  0x98   :  { %2821 = dma.done.wait [#allocation12], 9216  }
  0x99   :  { %2822 = vsyncadd [#allocation12], 4294958080 }
  0x9a   :  { %2823 = dma.done.wait [#allocation15], 768  }
  0x9b   :  { %2824 = vsyncadd [#allocation15], 4294966528  ;;  %v3059_v0 = vld [vmem:[#allocation2] sm:$0xff]  ;;  %v3061_v1 = vld [vmem:[#allocation2 + $0x8] sm:$0xff]  ;;  %v2841_v17 = vmov 0   ;;  %v2842_v22 = vmov 0.0   ;;  %v212_v56 = vlaneseq }
  0x9c   :  { %v170_v2 = vmul.f32 %v3059_v0, %v3059_v0  ;;  %v2407_v3 = vld [vmem:[#allocation5 + $0x4] ss:$8 sps:$4 sm:$0xff]   ;;  %v2409_v4 = vld [vmem:[#allocation5] ss:$8 sps:$4 sm:$0xff]   ;;  %v2410_v5 = vld [vmem:[#allocation5 + $0x14] ss:$8 sps:$4 sm:$0xff]   ;;  %v171_v6 = vmul.f32 %v3061_v1, %v3061_v1  ;;  %334 = vmatprep.mubr.bf16.mxu0 %v2841_v17  ;;  %2274 = vmatprep.subr.bf16.mxu1 %v2842_v22 }
  0x9d   :  { %302 = vmatprep.subr.bf16.mxu0 %v2407_v3  ;;  %v2412_v7 = vld [vmem:[#allocation5 + $0x10] ss:$8 sps:$4 sm:$0xff]   ;;  %v2413_v8 = vld [vmem:[#allocation5 + $0x24] ss:$8 sps:$4 sm:$0xff]   ;;  %v2415_v9 = vld [vmem:[#allocation5 + $0x20] ss:$8 sps:$4 sm:$0xff]  }
  0x9e   :  { %172 = vadd.xlane.f32.xlu0 %v170_v2  ;;  %303 = vmatpush1.bf16.msra.mxu0 %v2409_v4  ;;  %v2416_v10 = vld [vmem:[#allocation5 + $0x34] ss:$8 sps:$4 sm:$0xff]   ;;  %v2418_v11 = vld [vmem:[#allocation5 + $0x30] ss:$8 sps:$4 sm:$0xff]   ;;  %v2419_v12 = vld [vmem:[#allocation5 + $0x44] ss:$8 sps:$4 sm:$0xff]  }
  0x9f   :  { %304 = vmatprep.subr.bf16.mxu0 %v2410_v5  ;;  %v2421_v13 = vld [vmem:[#allocation5 + $0x40] ss:$8 sps:$4 sm:$0xff]   ;;  %v2422_v14 = vld [vmem:[#allocation5 + $0x54] ss:$8 sps:$4 sm:$0xff]   ;;  %v2424_v15 = vld [vmem:[#allocation5 + $0x50] ss:$8 sps:$4 sm:$0xff]  }
  0xa0   :  { %v2425_v16 = vld [vmem:[#allocation5 + $0x64] ss:$8 sps:$4 sm:$0xff]   ;;  %v2427_v18 = vld [vmem:[#allocation5 + $0x60] ss:$8 sps:$4 sm:$0xff]   ;;  %v2428_v19 = vld [vmem:[#allocation5 + $0x74] ss:$8 sps:$4 sm:$0xff]  }
  0xa1   :  { %v2430_v20 = vld [vmem:[#allocation5 + $0x70] ss:$8 sps:$4 sm:$0xff]   ;;  %v2431_v21 = vld [vmem:[#allocation7] sm:$0xff]   ;;  %v2432_v23 = vld [vmem:[#allocation7 + $0x8] sm:$0xff]   ;;  %s3311_s2 = sld [smem:[#allocation24_spill]]  ;;  %vm2843_vm0 = vmmov 0  }
  0xa2   :  { %174 = vadd.xlane.f32.xlu0 %v171_v6  ;;  %305 = vmatpush1.bf16.msra.mxu0 %v2412_v7  ;;  %v2433_v24 = vld [vmem:[#allocation7 + $0x10] sm:$0xff]   ;;  %v2434_v25 = vld [vmem:[#allocation7 + $0x18] sm:$0xff]   ;;  %v2435_v26 = vld [vmem:[#allocation7 + $0x20] sm:$0xff]   ;;  %v3088_v57 = vshrl.u32 %v212_v56, 7  ;;  %vm695_vm1 = vcmask 130048   ;;  %s2844_s13 = smov [#allocation16]  }
  0xa3   :  { %306 = vmatprep.subr.bf16.mxu0 %v2413_v8  ;;  %2275 = vmatpush3.bf16.msra.mxu1 %v2431_v21  ;;  %v2436_v27 = vld [vmem:[#allocation7 + $0x28] sm:$0xff]   ;;  %v2437_v42 = vld [vmem:[#allocation7 + $0x30] sm:$0xff]   ;;  %v2438_v43 = vld [vmem:[#allocation7 + $0x38] sm:$0xff]   ;;  %s2052_s20 = sshll.u32 %s2844_s13, 4  ;;  %s2053_s20 = int_to_ptr.vmem [resolvable:$true] %s2052_s20 }
  0xa4   :  { %2276 = vmatprep.subr.bf16.mxu1 %v2842_v22  ;;  %2290 = vmatprep.mubr.msk.bf16.mxu1 %vm2843_vm0, %v2842_v22  ;;  %v2439_v44 = vld [vmem:[#allocation8] ss:$8 sps:$4 sm:$0xff]   ;;  %v2441_v45 = vld [vmem:[#allocation8 + $0x4] ss:$8 sps:$4 sm:$0xff]   ;;  %v2444_v46 = vld [vmem:[#allocation8 + $0x14] ss:$8 sps:$4 sm:$0xff]   ;;  %p2798_p9 = scmp.lt.s32.totalorder %s2053_s20, %s2053_s20 }
  0xa5   :  { %v2442_v47 = vld [vmem:[#allocation8 + $0x10] ss:$8 sps:$4 sm:$0xff]   ;;  %v2447_v48 = vld [vmem:[#allocation8 + $0x24] ss:$8 sps:$4 sm:$0xff]   ;;  %v2445_v49 = vld [vmem:[#allocation8 + $0x20] ss:$8 sps:$4 sm:$0xff]  }
  0xa6   :  { %307 = vmatpush1.bf16.msra.mxu0 %v2415_v9  ;;  %v2450_v50 = vld [vmem:[#allocation8 + $0x34] ss:$8 sps:$4 sm:$0xff]   ;;  %v2448_v51 = vld [vmem:[#allocation8 + $0x30] ss:$8 sps:$4 sm:$0xff]   ;;  %v2453_v52 = vld [vmem:[#allocation8 + $0x44] ss:$8 sps:$4 sm:$0xff]  }
  0xa7   :  { %308 = vmatprep.subr.bf16.mxu0 %v2416_v10  ;;  %2277 = vmatpush3.bf16.msra.mxu1 %v2432_v23  ;;  %v3079_v37 = vld [vmem:[%s3311_s2] ss:$0 sm:$0xff]  ;;  %v2451_v53 = vld [vmem:[#allocation8 + $0x40] ss:$8 sps:$4 sm:$0xff]   ;;  %v2456_v54 = vld [vmem:[#allocation8 + $0x54] ss:$8 sps:$4 sm:$0xff]  }
  0xa8   :  { %2278 = vmatprep.subr.bf16.mxu1 %v2842_v22  ;;  %v2454_v55 = vld [vmem:[#allocation8 + $0x50] ss:$8 sps:$4 sm:$0xff]   ;;  %v3091_v58 = vsub.s32 1, %v3088_v57  ;;  %v2459_v4 = vld [vmem:[#allocation8 + $0x64] ss:$8 sps:$4 sm:$0xff]   ;;  %v3126_v21 = vsub.s32 0, %v3088_v57 }
  0xa9   :  { %v3096_v59 = vld [vmem:[%s3286_s3] sm:$0x3]  ;;  %v2457_v5 = vld [vmem:[#allocation8 + $0x60] ss:$8 sps:$4 sm:$0xff]   ;;  %v2462_v6 = vld [vmem:[#allocation8 + $0x74] ss:$8 sps:$4 sm:$0xff]  }
  0xaa   :  { %309 = vmatpush1.bf16.msra.mxu0 %v2418_v11  ;;  %v219_v61 = vrot.slane %v3096_v59, %v3091_v58  ;;  %v2460_v7 = vld [vmem:[#allocation8 + $0x70] ss:$8 sps:$4 sm:$0xff]  }
  0xab   :  { %310 = vmatprep.subr.bf16.mxu0 %v2419_v12  ;;  %2279 = vmatpush3.bf16.msra.mxu1 %v2433_v24  ;;  %v2085_v8 = vld [vmem:[%s3288_s5] ss:$0 sm:$0xff] }
  0xac   :  { %2280 = vmatprep.subr.bf16.mxu1 %v2842_v22 }
  0xae   :  { %311 = vmatpush1.bf16.msra.mxu0 %v2421_v13 }
  0xaf   :  { %312 = vmatprep.subr.bf16.mxu0 %v2422_v14  ;;  %2281 = vmatpush3.bf16.msra.mxu1 %v2434_v25 }
  0xb0   :  { %2282 = vmatprep.subr.bf16.mxu1 %v2842_v22 }
  0xb2   :  { %313 = vmatpush1.bf16.msra.mxu0 %v2424_v15 }
  0xb3   :  { %314 = vmatprep.subr.bf16.mxu0 %v2425_v16  ;;  %2283 = vmatpush3.bf16.msra.mxu1 %v2435_v26 }
  0xb4   :  { %2284 = vmatprep.subr.bf16.mxu1 %v2842_v22 }
  0xb6   :  { %315 = vmatpush1.bf16.msra.mxu0 %v2427_v18 }
  0xb7   :  { %316 = vmatprep.subr.bf16.mxu0 %v2428_v19  ;;  %2285 = vmatpush3.bf16.msra.mxu1 %v2436_v27  ;;  %v3118_v19 = vld [vmem:[#allocation14] sm:$0xff] }
  0xb8   :  { %2286 = vmatprep.subr.bf16.mxu1 %v2842_v22 }
  0xba   :  { %317 = vmatpush1.bf16.msra.mxu0 %v2430_v20  ;;  %v495_v20 = vld [vmem:[%s3290_s7] sm:$0x3] }
  0xbb   :  { %2287 = vmatpush3.bf16.msra.mxu1 %v2437_v42  ;;  %587 = vmatprep.subr.bf16.mxu0 %v2441_v45  ;;  %v500_v23 = vrot.slane %v495_v20, %v3126_v21 }
  0xbc   :  { %2288 = vmatprep.subr.bf16.mxu1 %v2842_v22 }
  0xbf   :  { %2289 = vmatpush3.bf16.msra.mxu1 %v2438_v43  ;;  %v2110_v43 = vld [vmem:[%s3291_s8] ss:$0 sm:$0xff] }
 0x12b   :  { %v173_v28 = vpop.xlane.xlu0 %172 }
 0x12c   :  { %v177_v29 = vmul.f32 0.0078125, %v173_v28 }
 0x12e   :  { %v179_v30 = vadd.f32 1e-08, %v177_v29 }
 0x12f   :  { %v175_v31 = vpop.xlane.xlu0 %174 }
 0x130   :  { %2567 = vrsqrt.f32 %v179_v30  ;;  %v178_v32 = vmul.f32 0.0078125, %v175_v31 }
 0x132   :  { %v180_v33 = vadd.f32 1e-08, %v178_v32 }
 0x134   :  { %2569 = vrsqrt.f32 %v180_v33 }
 0x13a   :  { %v2568_v34 = vpop.eup %2567 }
 0x13b   :  { %v183_v35 = vmul.f32 %v2568_v34, %v3059_v0 }
 0x13d   :  { %v191_v39 = vmul.f32 %v3079_v37, %v183_v35 }
 0x13e   :  { %v2570_v36 = vpop.eup %2569 }
 0x13f   :  { %v184_v38 = vmul.f32 %v2570_v36, %v3061_v1  ;;  %v504_v36 = vrot.slane %v495_v20, %v3091_v58 }
 0x141   :  { %v192_v40 = vmul.f32 %v3079_v37, %v184_v38 }
 0x143   :  { %v209_v41 = vpack.c.bf16 %v192_v40, %v191_v39 }
 0x145   :  { %335 = vmatmul.mubr.bf16.vlgmr.msra.gmra.mrb[0].mxu0 %v209_v41 }
 0x146   :  { %619 = vmatprep.mubr.bf16.mxu0 %v2841_v17  ;;  %588 = vmatpush1.bf16.msra.mxu0 %v2439_v44 }
 0x147   :  { %589 = vmatprep.subr.bf16.mxu0 %v2444_v46 }
 0x14a   :  { %590 = vmatpush1.bf16.msra.mxu0 %v2442_v47 }
 0x14b   :  { %591 = vmatprep.subr.bf16.mxu0 %v2447_v48 }
 0x14e   :  { %592 = vmatpush1.bf16.msra.mxu0 %v2445_v49 }
 0x14f   :  { %593 = vmatprep.subr.bf16.mxu0 %v2450_v50 }
 0x152   :  { %594 = vmatpush1.bf16.msra.mxu0 %v2448_v51 }
 0x153   :  { %595 = vmatprep.subr.bf16.mxu0 %v2453_v52 }
 0x156   :  { %596 = vmatpush1.bf16.msra.mxu0 %v2451_v53 }
 0x157   :  { %597 = vmatprep.subr.bf16.mxu0 %v2456_v54 }
 0x15a   :  { %598 = vmatpush1.bf16.msra.mxu0 %v2454_v55 }
 0x15b   :  { %599 = vmatprep.subr.bf16.mxu0 %v2459_v4 }
 0x15e   :  { %600 = vmatpush1.bf16.msra.mxu0 %v2457_v5 }
 0x15f   :  { %601 = vmatprep.subr.bf16.mxu0 %v2462_v6 }
 0x162   :  { %602 = vmatpush1.bf16.msra.mxu0 %v2460_v7 }
 0x218   :  { %v3098_v60 = vpop.f32.mrb[0].mxu0 }
 0x219   :  { %v338_v62 = vpop.f32.mrb[1].mxu0 }
 0x21a   :  { %v3102_v63 = vpop.f32.mrb[2].mxu0  ;;  %v339_v1 = vadd.f32 %v338_v62, %v219_v61 }
 0x21b   :  { %v342_v0 = vpop.f32.mrb[3].mxu0 }
 0x21c   :  { %v343_v2 = vadd.f32 %v342_v0, %v219_v61 }
 0x21e   :  { %v379_v3 = vpack.c.bf16 %v343_v2, %v339_v1 }
 0x220   :  { %2291 = vmatmul.mubr.bf16.vlgmr.msra.gmra.mrb[0].mxu1 %v379_v3 }
 0x221   :  { %2298 = vmatprep.mubr.msk.f32.mxu1 %vm695_vm1, %v3118_v19 }
 0x2f3   :  { %v469_v9 = vpop.f32.mrb[0].mxu1 }
 0x2f4   :  { %v3107_v10 = vadd.f32 %v2085_v8, %v469_v9  ;;  %v2292_v11 = vpop.f32.mrb[1].mxu1 }
 0x2f5   :  { %v472_v12 = vpop.f32.mrb[2].mxu1 }
 0x2f6   :  { %v3109_v13 = vadd.f32 %v2085_v8, %v472_v12  ;;  %v2293_v14 = vpop.f32.mrb[3].mxu1  ;;  %v476_v15 = vmax.f32 %v3107_v10, 0.0  ;;  %v859_v10 = vld [vmem:[#allocation14 + $0x10] sm:$0xff] }
 0x2f8   :  { %v477_v16 = vmax.f32 %v3109_v13, 0.0 }
 0x2fa   :  { %v494_v18 = vpack.c.bf16 %v477_v16, %v476_v15 }
 0x2fc   :  { %620 = vmatmul.mubr.bf16.vlgmr.msra.gmra.mrb[4].mxu0 %v494_v18 }
 0x2fd   :  { %1602 = vmatprep.mubr.bf16.mxu0 %v2841_v17 }
 0x3cf   :  { %v621_v24 = vpop.f32.mrb[4].mxu0 }
 0x3d0   :  { %v622_v25 = vadd.f32 %v621_v24, %v500_v23  ;;  %v623_v26 = vpop.f32.mrb[5].mxu0 }
 0x3d1   :  { %v625_v27 = vpop.f32.mrb[6].mxu0  ;;  %v624_v40 = vadd.f32 %v623_v26, %v504_v36 }
 0x3d2   :  { %v630_v28 = vsub.f32 0.0, %v622_v25  ;;  %v626_v29 = vadd.f32 %v625_v27, %v500_v23  ;;  %v627_v30 = vpop.f32.mrb[7].mxu0 }
 0x3d3   :  { %v628_v41 = vadd.f32 %v627_v30, %v504_v36  ;;  %v642_v42 = vsub.f32 0.0, %v624_v40  ;;  %v693_v36 = vld [vmem:[%s3299_s16] sm:$0xff] }
 0x3d4   :  { %v632_v31 = vmul.f32 1.442695, %v630_v28  ;;  %v631_v32 = vsub.f32 0.0, %v626_v29 }
 0x3d5   :  { %v643_v44 = vsub.f32 0.0, %v628_v41  ;;  %v644_v46 = vmul.f32 1.442695, %v642_v42 }
 0x3d6   :  { %2571 = vpow2.f32 %v632_v31  ;;  %v634_v33 = vmul.f32 1.442695, %v631_v32  ;;  %v692_v32 = vld [vmem:[#allocation14 + $0x8] sm:$0xff] }
 0x3d7   :  { %v646_v49 = vmul.f32 1.442695, %v643_v44 }
 0x3d8   :  { %2573 = vpow2.f32 %v634_v33 }
 0x3e0   :  { %v2572_v34 = vpop.eup %2571 }
 0x3e1   :  { %v636_v35 = vadd.f32 1.0, %v2572_v34  ;;  %v694_v34 = vld [vmem:[%s3299_s16 + $0x8] sm:$0xff] }
 0x3e2   :  { %v2574_v38 = vpop.eup %2573 }
 0x3e3   :  { %2575 = vrcp.f32 %v636_v35  ;;  %v637_v39 = vadd.f32 1.0, %v2574_v38 }
 0x3e5   :  { %2577 = vrcp.f32 %v637_v39 }
 0x3e6   :  { %2579 = vpow2.f32 %v644_v46 }
 0x3ed   :  { %v2576_v45 = vpop.eup %2575 }
 0x3ee   :  { %v661_v47 = vmul.f32 %v2576_v45, %v2110_v43  ;;  %v860_v45 = vld [vmem:[#allocation14 + $0x18] sm:$0xff] }
 0x3ef   :  { %v2578_v48 = vpop.eup %2577 }
 0x3f0   :  { %v663_v50 = vmul.f32 1.442695, %v661_v47  ;;  %v662_v51 = vmul.f32 %v2578_v48, %v2110_v43  ;;  %v2580_v53 = vpop.eup %2579  ;;  %v1027_v47 = vld [vmem:[#allocation14 + $0x20] sm:$0xff] }
 0x3f1   :  { %v648_v62 = vadd.f32 1.0, %v2580_v53 }
 0x3f2   :  { %2581 = vpow2.f32 %v663_v50  ;;  %v665_v52 = vmul.f32 1.442695, %v662_v51 }
 0x3f3   :  { %2583 = vpow2.f32 %v646_v49 }
 0x3f4   :  { %2585 = vpow2.f32 %v665_v52 }
 0x3f5   :  { %2587 = vrcp.f32 %v648_v62  ;;  %v2463_v62 = vld [vmem:[#allocation10] sm:$0xff]  }
 0x3fc   :  { %v2582_v54 = vpop.eup %2581 }
 0x3fd   :  { %v2584_v55 = vpop.eup %2583  ;;  %v667_v56 = vmul.f32 %v2582_v54, %v2582_v54 }
 0x3fe   :  { %v2586_v61 = vpop.eup %2585  ;;  %v649_v2 = vadd.f32 1.0, %v2584_v55 }
 0x3ff   :  { %v668_v0 = vmul.f32 %v2586_v61, %v2586_v61  ;;  %v669_v1 = vsub.f32 1.0, %v667_v56  ;;  %v2588_v6 = vpop.eup %2587  ;;  %v2373_v31 = vpack.c.bf16 %v2586_v61, %v2582_v54 }
 0x400   :  { %v687_v25 = vmul.f32 %v2588_v6, %v476_v15  ;;  %v2470_v6 = vld [vmem:[#allocation10 + $0x38] sm:$0xff]  }
 0x401   :  { %v670_v3 = vsub.f32 1.0, %v668_v0  ;;  %v671_v4 = vmax.f32 %v669_v1, 0.0  ;;  %v2464_v0 = vld [vmem:[#allocation10 + $0x8] sm:$0xff]   ;;  %v2465_v1 = vld [vmem:[#allocation10 + $0x10] sm:$0xff]  }
 0x403   :  { %v672_v5 = vmax.f32 %v670_v3, 0.0  ;;  %2589 = vrsqrt.f32 %v671_v4  ;;  %vm675_vm2 = vcmp.eq.f32.partialorder %v671_v4, inf  ;;  %v678_v12 = vand.u32 2147483648, %v671_v4  ;;  %v2467_v3 = vld [vmem:[#allocation10 + $0x20] sm:$0xff]  }
 0x404   :  { %2591 = vrcp.f32 %v649_v2  ;;  %vm677_vm3 = vcmp.eq.f32.partialorder %v671_v4, 0.0  ;;  %v2466_v2 = vld [vmem:[#allocation10 + $0x18] sm:$0xff]  }
 0x405   :  { %2593 = vrsqrt.f32 %v672_v5  ;;  %vm682_vm4 = vcmp.eq.f32.partialorder %v672_v5, inf  ;;  %v685_v23 = vand.u32 2147483648, %v672_v5  ;;  %vm684_vm5 = vcmp.eq.f32.partialorder %v672_v5, 0.0 }
 0x40d   :  { %v2590_v7 = vpop.eup %2589 }
 0x40e   :  { %v2592_v8 = vpop.eup %2591  ;;  %v674_v9 = vmul.f32 %v2590_v7, %v671_v4  ;;  %v215_v7 = vrot.slane %v3096_v59, %v3126_v21  ;;  %v2116_v59 = vld [vmem:[%s3299_s16 + $0x18] sm:$0xff] }
 0x40f   :  { %v2594_v11 = vpop.eup %2593  ;;  %v688_v26 = vmul.f32 %v2592_v8, %v477_v16 }
 0x410   :  { %v676_v14 = vsel %vm675_vm2, %v671_v4, %v674_v9  ;;  %v681_v18 = vmul.f32 %v2594_v11, %v672_v5  ;;  %v2468_v4 = vld [vmem:[#allocation10 + $0x28] sm:$0xff]   ;;  %v341_v8 = vadd.f32 %v3102_v63, %v215_v7  ;;  %v337_v9 = vadd.f32 %v3098_v60, %v215_v7  ;;  %v2115_v60 = vld [vmem:[%s3299_s16 + $0x10] sm:$0xff] }
 0x411   :  { %v679_v20 = vsel %vm677_vm3, %v678_v12, %v676_v14  ;;  %v2483_v7 = vld [vmem:[#allocation11 + $0x60] ss:$24 sps:$4 sm:$0xff]  }
 0x412   :  { %v683_v24 = vsel %vm682_vm4, %v672_v5, %v681_v18  ;;  %v689_v28 = vmul.f32 %v687_v25, %v679_v20  ;;  %v2469_v5 = vld [vmem:[#allocation10 + $0x30] sm:$0xff]   ;;  %v348_v11 = vmul.f32 0.044715, %v341_v8  ;;  %v347_v12 = vmul.f32 0.044715, %v337_v9 }
 0x413   :  { %v686_v27 = vsel %vm684_vm5, %v685_v23, %v683_v24 }
 0x414   :  { %v690_v29 = vmul.f32 %v688_v26, %v686_v27  ;;  %v350_v14 = vmul.f32 %v348_v11, %v341_v8  ;;  %v349_v18 = vmul.f32 %v347_v12, %v337_v9  ;;  %v2491_v11 = vld [vmem:[#allocation11 + $0x94] ss:$24 sps:$4 sm:$0xff]   ;;  %v2489_v12 = vld [vmem:[#allocation11 + $0x90] ss:$24 sps:$4 sm:$0xff]  }
 0x416   :  { %v2369_v30 = vpack.c.bf16 %v690_v29, %v689_v28  ;;  %v352_v20 = vmul.f32 %v350_v14, %v341_v8  ;;  %v351_v23 = vmul.f32 %v349_v18, %v337_v9  ;;  %v2494_v14 = vld [vmem:[#allocation11 + $0x9c] ss:$24 sps:$4 sm:$0xff]   ;;  %v2492_v18 = vld [vmem:[#allocation11 + $0x98] ss:$24 sps:$4 sm:$0xff]  }
 0x418   :  { %2370 = vmatprep.subr.bf16.mxu1 %v2369_v30  ;;  %v354_v24 = vadd.f32 %v352_v20, %v341_v8  ;;  %v353_v25 = vadd.f32 %v351_v23, %v337_v9  ;;  %v2497_v20 = vld [vmem:[#allocation11 + $0xc4] ss:$24 sps:$4 sm:$0xff]   ;;  %v2495_v23 = vld [vmem:[#allocation11 + $0xc0] ss:$24 sps:$4 sm:$0xff]  }
 0x419   :  { %2372 = vmatpush3.bf16.msra.mxu1 %v2369_v30 }
 0x41a   :  { %2374 = vmatprep.subr.bf16.mxu1 %v2373_v31  ;;  %v356_v26 = vmul.f32 0.7978846, %v354_v24  ;;  %v355_v27 = vmul.f32 0.7978846, %v353_v25  ;;  %v2498_v24 = vld [vmem:[#allocation11 + $0xc8] ss:$24 sps:$4 sm:$0xff]  }
 0x41b   :  { %v2500_v25 = vld [vmem:[#allocation11 + $0xcc] ss:$24 sps:$4 sm:$0xff]  }
 0x41c   :  { %2299 = vmatmul.mubr.msk.f32.vlgmr.msra.gmra.mrb[4].mxu1 %vm695_vm1, %v692_v32  ;;  %2595 = vtanh.f32 %v356_v26  ;;  %v2503_v26 = vld [vmem:[#allocation11 + $0xf4] ss:$24 sps:$4 sm:$0xff]  }
 0x41d   :  { %2376 = vmatpush3.bf16.msra.mxu1 %v2373_v31  ;;  %2305 = vmatprep.mubr.msk.f32.mxu1 %vm695_vm1, %v3118_v19  ;;  %2597 = vtanh.f32 %v355_v27  ;;  %v2501_v27 = vld [vmem:[#allocation11 + $0xf0] ss:$24 sps:$4 sm:$0xff]  }
 0x420   :  { %2306 = vmatmul.mubr.msk.f32.vlgmr.msra.gmra.mrb[6].mxu1 %vm695_vm1, %v692_v32 }
 0x421   :  { %2312 = vmatprep.mubr.msk.f32.mxu1 %vm695_vm1, %v859_v10 }
 0x4ef   :  { %v2300_v13 = vpop.f32.mrb[4].mxu1 }
 0x4f0   :  { %v853_v15 = vmul.f32 %v2586_v61, %v2300_v13  ;;  %v768_v16 = vpop.f32.mrb[5].mxu1 }
 0x4f1   :  { %v852_v33 = vmul.f32 %v2582_v54, %v768_v16  ;;  %v346_v16 = vmul.f32 0.5, %v341_v8  ;;  %v2488_v8 = vld [vmem:[#allocation11 + $0x6c] ss:$24 sps:$4 sm:$0xff]  }
 0x4f2   :  { %v855_v35 = vadd.f32 %v853_v15, %v690_v29 }
 0x4f3   :  { %v854_v38 = vadd.f32 %v852_v33, %v689_v28  ;;  %v2307_v19 = vpop.f32.mrb[6].mxu1  ;;  %v2596_v28 = vpop.eup %2595 }
 0x4f4   :  { %v849_v39 = vadd.f32 %v2307_v19, %v694_v34  ;;  %v843_v40 = vpop.f32.mrb[7].mxu1  ;;  %v2598_v30 = vpop.eup %2597  ;;  %v360_v31 = vadd.f32 1.0, %v2596_v28  ;;  %v2512_v28 = vld [vmem:[#allocation11 + $0x12c] ss:$24 sps:$4 sm:$0xff]  }
 0x4f5   :  { %v844_v41 = vadd.f32 %v843_v40, %v693_v36  ;;  %v2377_v42 = vpack.c.bf16 %v855_v35, %v854_v38  ;;  %v359_v13 = vadd.f32 1.0, %v2598_v30  ;;  %v2510_v30 = vld [vmem:[#allocation11 + $0x128] ss:$24 sps:$4 sm:$0xff]  }
 0x4f6   :  { %v3148_v43 = vmul.f32 %v2586_v61, %v849_v39  ;;  %v1028_v61 = vld [vmem:[#allocation14 + $0x28] sm:$0xff] }
 0x4f7   :  { %v3150_v44 = vmul.f32 %v2582_v54, %v844_v41  ;;  %2378 = vmatprep.subr.bf16.mxu1 %v2377_v42 }
 0x4f8   :  { %2380 = vmatpush3.bf16.msra.mxu1 %v2377_v42 }
 0x4f9   :  { %v2381_v46 = vpack.c.bf16 %v3148_v43, %v3150_v44 }
 0x4fb   :  { %2313 = vmatmul.mubr.msk.f32.vlgmr.msra.gmra.mrb[8].mxu1 %vm695_vm1, %v860_v45  ;;  %2382 = vmatprep.subr.bf16.mxu1 %v2381_v46 }
 0x4fc   :  { %2384 = vmatpush3.bf16.msra.mxu1 %v2381_v46  ;;  %2319 = vmatprep.mubr.msk.f32.mxu1 %vm695_vm1, %v859_v10  ;;  %v2473_v46 = vld [vmem:[#allocation11 + $0x4] ss:$24 sps:$4 sm:$0xff]  }
 0x4fd   :  { %1570 = vmatprep.subr.bf16.mxu0 %v2473_v46 }
 0x4ff   :  { %2320 = vmatmul.mubr.msk.f32.vlgmr.msra.gmra.mrb[10].mxu1 %vm695_vm1, %v860_v45 }
 0x500   :  { %2326 = vmatprep.mubr.msk.f32.mxu1 %vm695_vm1, %v1027_v47  ;;  %v2476_v47 = vld [vmem:[#allocation11 + $0xc] ss:$24 sps:$4 sm:$0xff]  }
 0x5ce   :  { %v2314_v48 = vpop.f32.mrb[8].mxu1 }
 0x5cf   :  { %v1021_v49 = vmul.f32 %v2314_v48, %v3148_v43  ;;  %v936_v50 = vpop.f32.mrb[9].mxu1  ;;  %v2479_v48 = vld [vmem:[#allocation11 + $0x34] ss:$24 sps:$4 sm:$0xff]  }
 0x5d0   :  { %v1020_v51 = vmul.f32 %v936_v50, %v3150_v44  ;;  %v2477_v50 = vld [vmem:[#allocation11 + $0x30] ss:$24 sps:$4 sm:$0xff]  }
 0x5d1   :  { %v3160_v52 = vadd.f32 %v1021_v49, %v855_v35  ;;  %v345_v35 = vmul.f32 0.5, %v337_v9  ;;  %v2482_v49 = vld [vmem:[#allocation11 + $0x3c] ss:$24 sps:$4 sm:$0xff]   ;;  %v2486_v9 = vld [vmem:[#allocation11 + $0x68] ss:$24 sps:$4 sm:$0xff]  }
 0x5d2   :  { %v3162_v53 = vadd.f32 %v1020_v51, %v854_v38  ;;  %v2321_v54 = vpop.f32.mrb[10].mxu1  ;;  %v362_v38 = vmul.f32 %v360_v31, %v346_v16  ;;  %v2480_v51 = vld [vmem:[#allocation11 + $0x38] ss:$24 sps:$4 sm:$0xff]   ;;  %v2515_v31 = vld [vmem:[#allocation11 + $0x154] ss:$24 sps:$4 sm:$0xff]  }
 0x5d3   :  { %v1011_v55 = vpop.f32.mrb[11].mxu1  ;;  %v1017_v63 = vadd.f32 %v2321_v54, %v2116_v59  ;;  %v361_v39 = vmul.f32 %v359_v13, %v345_v35  ;;  %v2615_v54 = vld [vmem:[#allocation2] sm:$0xff] }
 0x5d4   :  { %v2385_v56 = vpack.c.bf16 %v3160_v52, %v3162_v53  ;;  %v1012_v29 = vadd.f32 %v2115_v60, %v1011_v55  ;;  %v2506_v59 = vld [vmem:[#allocation11 + $0xfc] ss:$24 sps:$4 sm:$0xff]   ;;  %v2504_v60 = vld [vmem:[#allocation11 + $0xf8] ss:$24 sps:$4 sm:$0xff]  }
 0x5d5   :  { %v1025_v32 = vmul.f32 %v1017_v63, %v3148_v43  ;;  %v2471_v43 = vld [vmem:[#allocation11] ss:$24 sps:$4 sm:$0xff]   ;;  %v2509_v63 = vld [vmem:[#allocation11 + $0x124] ss:$24 sps:$4 sm:$0xff]  }
 0x5d6   :  { %2386 = vmatprep.subr.bf16.mxu1 %v2385_v56  ;;  %v1024_v15 = vmul.f32 %v1012_v29, %v3150_v44  ;;  %v2474_v44 = vld [vmem:[#allocation11 + $0x8] ss:$24 sps:$4 sm:$0xff]   ;;  %1571 = vmatpush1.bf16.msra.mxu0 %v2471_v43  ;;  %v2516_v13 = vld [vmem:[#allocation11 + $0x158] ss:$24 sps:$4 sm:$0xff]  }
 0x5d7   :  { %2388 = vmatpush3.bf16.msra.mxu1 %v2385_v56  ;;  %1572 = vmatprep.subr.bf16.mxu0 %v2479_v48  ;;  %v2507_v29 = vld [vmem:[#allocation11 + $0x120] ss:$24 sps:$4 sm:$0xff]   ;;  %v2519_v43 = vld [vmem:[#allocation11 + $0x10] ss:$24 sps:$4 sm:$0xff]   ;;  %v2527_v48 = vld [vmem:[#allocation11 + $0x74] ss:$24 sps:$4 sm:$0xff]  }
 0x5d8   :  { %2329 = vmatprep.subr.bf16.mxu1 %v2842_v22 }
 0x5da   :  { %2327 = vmatmul.mubr.msk.f32.vlgmr.msra.gmra.mrb[12].mxu1 %vm695_vm1, %v1028_v61  ;;  %1573 = vmatpush1.bf16.msra.mxu0 %v2477_v50  ;;  %v2530_v50 = vld [vmem:[#allocation11 + $0xa4] ss:$24 sps:$4 sm:$0xff]  }
 0x5db   :  { %2330 = vmatpush3.bf16.msra.mxu1 %v2463_v62  ;;  %2345 = vmatprep.mubr.msk.bf16.mxu1 %vm2843_vm0, %v2842_v22 }
 0x5dc   :  { %2331 = vmatprep.subr.bf16.mxu1 %v2842_v22 }
 0x5df   :  { %2332 = vmatpush3.bf16.msra.mxu1 %v2464_v0  ;;  %v2616_v0 = vld [vmem:[#allocation2 + $0x8] sm:$0xff] }
 0x5e0   :  { %2333 = vmatprep.subr.bf16.mxu1 %v2842_v22 }
 0x5e3   :  { %2334 = vmatpush3.bf16.msra.mxu1 %v2465_v1 }
 0x5e4   :  { %2335 = vmatprep.subr.bf16.mxu1 %v2842_v22 }
 0x5e7   :  { %2336 = vmatpush3.bf16.msra.mxu1 %v2466_v2 }
 0x5e8   :  { %2337 = vmatprep.subr.bf16.mxu1 %v2842_v22 }
 0x5eb   :  { %2338 = vmatpush3.bf16.msra.mxu1 %v2467_v3 }
 0x5ec   :  { %2339 = vmatprep.subr.bf16.mxu1 %v2842_v22 }
 0x5ef   :  { %2340 = vmatpush3.bf16.msra.mxu1 %v2468_v4 }
 0x5f0   :  { %2341 = vmatprep.subr.bf16.mxu1 %v2842_v22 }
 0x5f3   :  { %2342 = vmatpush3.bf16.msra.mxu1 %v2469_v5 }
 0x5f4   :  { %2343 = vmatprep.subr.bf16.mxu1 %v2842_v22 }
 0x5f7   :  { %2344 = vmatpush3.bf16.msra.mxu1 %v2470_v6  ;;  %v2485_v6 = vld [vmem:[#allocation11 + $0x64] ss:$24 sps:$4 sm:$0xff]  }
 0x5f8   :  { %1613 = vmatprep.subr.bf16.mxu1 %v2476_v47  ;;  %1574 = vmatprep.subr.bf16.mxu0 %v2485_v6  ;;  %v2522_v47 = vld [vmem:[#allocation11 + $0x40] ss:$24 sps:$4 sm:$0xff]   ;;  %v2548_v6 = vld [vmem:[#allocation13 + $0x88] sm:$0xff]  }
 0x5f9   :  { %1575 = vmatpush1.bf16.msra.mxu0 %v2483_v7  ;;  %v2549_v7 = vld [vmem:[#allocation13 + $0x50] sm:$0xff]  }
 0x5fa   :  { %1576 = vmatprep.subr.bf16.mxu0 %v2491_v11  ;;  %v2552_v11 = vld [vmem:[#allocation13 + $0x58] sm:$0xff]  }
 0x5fd   :  { %1577 = vmatpush1.bf16.msra.mxu0 %v2489_v12  ;;  %v2553_v12 = vld [vmem:[#allocation13 + $0x18] sm:$0xff]  }
 0x5fe   :  { %1578 = vmatprep.subr.bf16.mxu0 %v2497_v20  ;;  %v2556_v20 = vld [vmem:[#allocation13 + $0x20] sm:$0xff]  }
 0x601   :  { %1579 = vmatpush1.bf16.msra.mxu0 %v2495_v23  ;;  %v2557_v23 = vld [vmem:[#allocation13 + $0xa0] sm:$0xff]  }
 0x602   :  { %1580 = vmatprep.subr.bf16.mxu0 %v2503_v26  ;;  %v2560_v26 = vld [vmem:[#allocation13 + $0xa8] sm:$0xff]  }
 0x605   :  { %1581 = vmatpush1.bf16.msra.mxu0 %v2501_v27  ;;  %v2561_v27 = vld [vmem:[#allocation13 + $0x70] sm:$0xff]  }
 0x606   :  { %1582 = vmatprep.subr.bf16.mxu0 %v2509_v63  ;;  %v2564_v63 = vld [vmem:[#allocation13 + $0x78] sm:$0xff]  }
 0x609   :  { %1583 = vmatpush1.bf16.msra.mxu0 %v2507_v29  ;;  %v2566_v29 = vld [vmem:[#allocation13 + $0xb8] sm:$0xff]  }
 0x60a   :  { %1584 = vmatprep.subr.bf16.mxu0 %v2515_v31  ;;  %v3222_v31 = vld [vmem:[%s3295_s12] sm:$0x3f] }
 0x6ad   :  { %v2328_v10 = vpop.f32.mrb[12].mxu1 }
 0x6ae   :  { %v1111_v33 = vmul.f32 %v2328_v10, %v1025_v32  ;;  %v1101_v34 = vpop.f32.mrb[13].mxu1  ;;  %v2518_v32 = vld [vmem:[#allocation11 + $0x15c] ss:$24 sps:$4 sm:$0xff]   ;;  %v2513_v10 = vld [vmem:[#allocation11 + $0x150] ss:$24 sps:$4 sm:$0xff]  }
 0x6af   :  { %v1110_v36 = vmul.f32 %v1101_v34, %v1024_v15  ;;  %v2521_v15 = vld [vmem:[#allocation11 + $0x14] ss:$24 sps:$4 sm:$0xff]   ;;  %1585 = vmatpush1.bf16.msra.mxu0 %v2513_v10 }
 0x6b0   :  { %v1113_v19 = vadd.f32 %v1111_v33, %v3160_v52  ;;  %1656 = vmatprep.subr.bf16.mxu0 %v2521_v15 }
 0x6b1   :  { %v1112_v40 = vadd.f32 %v1110_v36, %v3162_v53  ;;  %v2131_v53 = vld [vmem:[%s3293_s10] ss:$0 sm:$0xff] }
 0x6b2   :  { %v1115_v41 = vmul.f32 %v1113_v19, %v362_v38 }
 0x6b3   :  { %v1114_v42 = vmul.f32 %v1112_v40, %v361_v39 }
 0x6b5   :  { %v1132_v45 = vpack.c.bf16 %v1115_v41, %v1114_v42 }
 0x6b7   :  { %2346 = vmatmul.mubr.bf16.vlgmr.msra.gmra.mrb[16].mxu1 %v1132_v45 }
 0x6b8   :  { %1645 = vmatprep.mubr.bf16.mxu1 %v2841_v17  ;;  %1614 = vmatpush1.bf16.msra.mxu1 %v2474_v44  ;;  %v2524_v44 = vld [vmem:[#allocation11 + $0x44] ss:$24 sps:$4 sm:$0xff]  }
 0x6b9   :  { %1615 = vmatprep.subr.bf16.mxu1 %v2482_v49  ;;  %v2525_v49 = vld [vmem:[#allocation11 + $0x70] ss:$24 sps:$4 sm:$0xff]  }
 0x6bc   :  { %1616 = vmatpush1.bf16.msra.mxu1 %v2480_v51  ;;  %v2528_v51 = vld [vmem:[#allocation11 + $0xa0] ss:$24 sps:$4 sm:$0xff]  }
 0x6bd   :  { %1617 = vmatprep.subr.bf16.mxu1 %v2488_v8  ;;  %v2550_v8 = vld [vmem:[#allocation13 + $0x10] sm:$0xff]  }
 0x6c0   :  { %1618 = vmatpush1.bf16.msra.mxu1 %v2486_v9  ;;  %v2551_v9 = vld [vmem:[#allocation13 + $0x90] sm:$0xff]  }
 0x6c1   :  { %1619 = vmatprep.subr.bf16.mxu1 %v2494_v14  ;;  %v2554_v14 = vld [vmem:[#allocation13 + $0x98] sm:$0xff]  }
 0x6c4   :  { %1620 = vmatpush1.bf16.msra.mxu1 %v2492_v18  ;;  %v2555_v18 = vld [vmem:[#allocation13 + $0x60] sm:$0xff]  }
 0x6c5   :  { %1621 = vmatprep.subr.bf16.mxu1 %v2500_v25  ;;  %v2559_v25 = vld [vmem:[#allocation13 + $0x28] sm:$0xff]  }
 0x6c8   :  { %1622 = vmatpush1.bf16.msra.mxu1 %v2498_v24  ;;  %v2558_v24 = vld [vmem:[#allocation13 + $0x68] sm:$0xff]  }
 0x6c9   :  { %1623 = vmatprep.subr.bf16.mxu1 %v2506_v59  ;;  %v2562_v59 = vld [vmem:[#allocation13 + $0x30] sm:$0xff]  }
 0x6cc   :  { %1624 = vmatpush1.bf16.msra.mxu1 %v2504_v60  ;;  %v2563_v60 = vld [vmem:[#allocation13 + $0xb0] sm:$0xff]  }
 0x6cd   :  { %1625 = vmatprep.subr.bf16.mxu1 %v2512_v28  ;;  %v2565_v28 = vld [vmem:[#allocation13 + $0x38] sm:$0xff]  }
 0x6d0   :  { %1626 = vmatpush1.bf16.msra.mxu1 %v2510_v30  ;;  %v1310_v30 = vsub.s32 2, %v3088_v57 }
 0x6d1   :  { %1627 = vmatprep.subr.bf16.mxu1 %v2518_v32  ;;  %v1303_v32 = vrot.slane %v3222_v31, %v3126_v21 }
 0x6d2   :  { %v1311_v10 = vrot.slane %v3222_v31, %v1310_v30 }
 0x6d4   :  { %1628 = vmatpush1.bf16.msra.mxu1 %v2516_v13 }
 0x78a   :  { %v1215_v52 = vpop.f32.mrb[16].mxu1 }
 0x78b   :  { %v1222_v55 = vadd.f32 %v2615_v54, %v1215_v52  ;;  %v2347_v56 = vpop.f32.mrb[17].mxu1  ;;  %v2533_v52 = vld [vmem:[#allocation11 + $0xd4] ss:$24 sps:$4 sm:$0xff]   ;;  %v2534_v54 = vld [vmem:[#allocation11 + $0x100] ss:$24 sps:$4 sm:$0xff]  }
 0x78c   :  { %v1218_v61 = vpop.f32.mrb[18].mxu1  ;;  %v2542_v56 = vld [vmem:[#allocation11 + $0x164] ss:$24 sps:$4 sm:$0xff]  }
 0x78d   :  { %v3195_v62 = vadd.f32 %v2131_v53, %v1222_v55  ;;  %v1223_v1 = vadd.f32 %v2616_v0, %v1218_v61  ;;  %v2348_v2 = vpop.f32.mrb[19].mxu1  ;;  %v2539_v55 = vld [vmem:[#allocation11 + $0x134] ss:$24 sps:$4 sm:$0xff]   ;;  %v2540_v61 = vld [vmem:[#allocation11 + $0x160] ss:$24 sps:$4 sm:$0xff]  }
 0x78e   :  { %v2543_v0 = vld [vmem:[#allocation13 + $0x40] sm:$0xff]  }
 0x78f   :  { %v3197_v3 = vadd.f32 %v2131_v53, %v1223_v1  ;;  %v1233_v4 = vmul.f32 %v3195_v62, %v3195_v62  ;;  %v2536_v53 = vld [vmem:[#allocation11 + $0x104] ss:$24 sps:$4 sm:$0xff]   ;;  %2243 = vmatprep.subr.bf16.mxu1 %v2543_v0 }
 0x790   :  { %v2544_v1 = vld [vmem:[#allocation13] sm:$0xff]  }
 0x791   :  { %1235 = vadd.xlane.f32.xlu1 %v1233_v4  ;;  %v1234_v5 = vmul.f32 %v3197_v3, %v3197_v3  ;;  %v2545_v2 = vld [vmem:[#allocation13 + $0x80] sm:$0xff]   ;;  %v2546_v4 = vld [vmem:[#allocation13 + $0x48] sm:$0xff]  }
 0x795   :  { %1237 = vadd.xlane.f32.xlu1 %v1234_v5  ;;  %v2547_v5 = vld [vmem:[#allocation13 + $0x8] sm:$0xff]  }
 0x81e   :  { %v1236_v16 = vpop.xlane.xlu1 %1235 }
 0x81f   :  { %v1239_v33 = vmul.f32 0.0078125, %v1236_v16 }
 0x821   :  { %v1241_v34 = vadd.f32 1e-08, %v1239_v33 }
 0x822   :  { %v1238_v35 = vpop.xlane.xlu1 %1237 }
 0x823   :  { %2599 = vrsqrt.f32 %v1241_v34  ;;  %v1240_v36 = vmul.f32 0.0078125, %v1238_v35 }
 0x825   :  { %v1242_v38 = vadd.f32 1e-08, %v1240_v36 }
 0x827   :  { %2601 = vrsqrt.f32 %v1242_v38 }
 0x82d   :  { %v2600_v19 = vpop.eup %2599 }
 0x82e   :  { %v1245_v39 = vmul.f32 %v2600_v19, %v3195_v62 }
 0x830   :  { %v1247_v42 = vmul.f32 %v3079_v37, %v1245_v39 }
 0x831   :  { %v2602_v40 = vpop.eup %2601 }
 0x832   :  { %v1246_v41 = vmul.f32 %v2602_v40, %v3197_v3 }
 0x834   :  { %v1248_v45 = vmul.f32 %v3079_v37, %v1246_v41  ;;  %v2531_v37 = vld [vmem:[#allocation11 + $0xd0] ss:$24 sps:$4 sm:$0xff]  }
 0x836   :  { %v1297_v46 = vpack.c.bf16 %v1248_v45, %v1247_v42 }
 0x838   :  { %1603 = vmatmul.mubr.bf16.vlgmr.msra.gmra.mrb[8].mxu0 %v1297_v46  ;;  %1646 = vmatmul.mubr.bf16.vlgmr.msra.gmra.mrb[20].mxu1 %v1297_v46 }
 0x839   :  { %1657 = vmatpush1.bf16.msra.mxu0 %v2519_v43  ;;  %1688 = vmatprep.mubr.bf16.mxu0 %v2841_v17  ;;  %v2537_v17 = vld [vmem:[#allocation11 + $0x130] ss:$24 sps:$4 sm:$0xff]  }
 0x83a   :  { %1658 = vmatprep.subr.bf16.mxu0 %v2524_v44  ;;  %2244 = vmatpush3.bf16.msra.mxu1 %v2544_v1 }
 0x83b   :  { %2245 = vmatprep.subr.bf16.mxu1 %v2546_v4 }
 0x83d   :  { %1659 = vmatpush1.bf16.msra.mxu0 %v2522_v47 }
 0x83e   :  { %1660 = vmatprep.subr.bf16.mxu0 %v2527_v48  ;;  %2246 = vmatpush3.bf16.msra.mxu1 %v2547_v5 }
 0x83f   :  { %2247 = vmatprep.subr.bf16.mxu1 %v2549_v7 }
 0x841   :  { %1661 = vmatpush1.bf16.msra.mxu0 %v2525_v49 }
 0x842   :  { %1662 = vmatprep.subr.bf16.mxu0 %v2530_v50  ;;  %2248 = vmatpush3.bf16.msra.mxu1 %v2550_v8 }
 0x843   :  { %2249 = vmatprep.subr.bf16.mxu1 %v2552_v11 }
 0x845   :  { %1663 = vmatpush1.bf16.msra.mxu0 %v2528_v51 }
 0x846   :  { %1664 = vmatprep.subr.bf16.mxu0 %v2533_v52  ;;  %2250 = vmatpush3.bf16.msra.mxu1 %v2553_v12 }
 0x847   :  { %2251 = vmatprep.subr.bf16.mxu1 %v2555_v18  ;;  %v1314_v18 = vsub.s32 3, %v3088_v57 }
 0x849   :  { %1665 = vmatpush1.bf16.msra.mxu0 %v2531_v37 }
 0x84a   :  { %1666 = vmatprep.subr.bf16.mxu0 %v2536_v53  ;;  %2252 = vmatpush3.bf16.msra.mxu1 %v2556_v20  ;;  %v1315_v20 = vrot.slane %v3222_v31, %v1314_v18 }
 0x84b   :  { %2253 = vmatprep.subr.bf16.mxu1 %v2558_v24 }
 0x84d   :  { %1667 = vmatpush1.bf16.msra.mxu0 %v2534_v54 }
 0x84e   :  { %1668 = vmatprep.subr.bf16.mxu0 %v2539_v55  ;;  %2254 = vmatpush3.bf16.msra.mxu1 %v2559_v25 }
 0x84f   :  { %2255 = vmatprep.subr.bf16.mxu1 %v2561_v27  ;;  %v1318_v27 = vsub.s32 4, %v3088_v57 }
 0x851   :  { %1669 = vmatpush1.bf16.msra.mxu0 %v2537_v17 }
 0x852   :  { %1670 = vmatprep.subr.bf16.mxu0 %v2542_v56  ;;  %2256 = vmatpush3.bf16.msra.mxu1 %v2562_v59  ;;  %v1322_v59 = vsub.s32 5, %v3088_v57 }
 0x853   :  { %2257 = vmatprep.subr.bf16.mxu1 %v2564_v63 }
 0x855   :  { %1671 = vmatpush1.bf16.msra.mxu0 %v2540_v61 }
 0x856   :  { %2349 = vmatprep.subr.bf16.mxu0 %v2842_v22  ;;  %2258 = vmatpush3.bf16.msra.mxu1 %v2565_v28 }
 0x858   :  { %1689 = vmatmul.mubr.bf16.vlgmr.msra.gmra.mrb[12].mxu0 %v1297_v46 }
 0x859   :  { %2365 = vmatprep.mubr.msk.bf16.mxu0 %vm2843_vm0, %v2842_v22  ;;  %2350 = vmatpush3.bf16.msra.mxu0 %v2545_v2 }
 0x85a   :  { %2351 = vmatprep.subr.bf16.mxu0 %v2842_v22 }
 0x85d   :  { %2352 = vmatpush3.bf16.msra.mxu0 %v2548_v6 }
 0x85e   :  { %2353 = vmatprep.subr.bf16.mxu0 %v2842_v22 }
 0x861   :  { %2354 = vmatpush3.bf16.msra.mxu0 %v2551_v9 }
 0x862   :  { %2355 = vmatprep.subr.bf16.mxu0 %v2842_v22 }
 0x865   :  { %2356 = vmatpush3.bf16.msra.mxu0 %v2554_v14 }
 0x866   :  { %2357 = vmatprep.subr.bf16.mxu0 %v2842_v22 }
 0x869   :  { %2358 = vmatpush3.bf16.msra.mxu0 %v2557_v23 }
 0x86a   :  { %2359 = vmatprep.subr.bf16.mxu0 %v2842_v22 }
 0x86d   :  { %2360 = vmatpush3.bf16.msra.mxu0 %v2560_v26 }
 0x86e   :  { %2361 = vmatprep.subr.bf16.mxu0 %v2842_v22 }
 0x871   :  { %2362 = vmatpush3.bf16.msra.mxu0 %v2563_v60 }
 0x872   :  { %2363 = vmatprep.subr.bf16.mxu0 %v2842_v22  ;;  %v1307_v22 = vrot.slane %v3222_v31, %v3091_v58 }
 0x875   :  { %2364 = vmatpush3.bf16.msra.mxu0 %v2566_v29 }
 0x90b   :  { %v1604_v13 = vpop.f32.mrb[8].mxu0  ;;  %v1647_v15 = vpop.f32.mrb[20].mxu1 }
 0x90c   :  { %v1605_v16 = vadd.f32 %v1604_v13, %v1303_v32  ;;  %v3229_v33 = vadd.f32 %v1647_v15, %v1311_v10  ;;  %v1606_v34 = vpop.f32.mrb[9].mxu0  ;;  %v1649_v35 = vpop.f32.mrb[21].mxu1 }
 0x90d   :  { %v3231_v36 = vadd.f32 %v1606_v34, %v1307_v22  ;;  %v1608_v38 = vpop.f32.mrb[10].mxu0  ;;  %v1651_v19 = vpop.f32.mrb[22].mxu1  ;;  %v1650_v63 = vadd.f32 %v1649_v35, %v1315_v20 }
 0x90e   :  { %v1705_v39 = vmul.f32 0.044715, %v1605_v16  ;;  %v1707_v40 = vmul.f32 0.044715, %v3229_v33  ;;  %v1609_v21 = vadd.f32 %v1608_v38, %v1303_v32  ;;  %v1610_v41 = vpop.f32.mrb[11].mxu0  ;;  %v3235_v45 = vadd.f32 %v1651_v19, %v1311_v10  ;;  %v1653_v43 = vpop.f32.mrb[23].mxu1 }
 0x90f   :  { %v1706_v42 = vmul.f32 0.044715, %v3231_v36  ;;  %v3237_v58 = vadd.f32 %v1610_v41, %v1307_v22  ;;  %v1699_v24 = vmul.f32 0.5, %v1605_v16  ;;  %v1654_v13 = vadd.f32 %v1653_v43, %v1315_v20 }
 0x910   :  { %v1711_v46 = vmul.f32 %v1705_v39, %v1605_v16  ;;  %v1713_v44 = vmul.f32 %v1707_v40, %v3229_v33  ;;  %v1708_v47 = vmul.f32 0.044715, %v1609_v21  ;;  %v1710_v49 = vmul.f32 0.044715, %v3235_v45 }
 0x911   :  { %v1712_v48 = vmul.f32 %v1706_v42, %v3231_v36  ;;  %v1709_v50 = vmul.f32 0.044715, %v3237_v58  ;;  %v1702_v29 = vmul.f32 0.5, %v1609_v21  ;;  %v1319_v38 = vrot.slane %v3222_v31, %v1318_v27 }
 0x912   :  { %v1717_v51 = vmul.f32 %v1711_v46, %v1605_v16  ;;  %v1714_v52 = vmul.f32 %v1708_v47, %v1609_v21  ;;  %v1719_v37 = vmul.f32 %v1713_v44, %v3229_v33  ;;  %v1716_v53 = vmul.f32 %v1710_v49, %v3235_v45 }
 0x913   :  { %v1715_v54 = vmul.f32 %v1709_v50, %v3237_v58  ;;  %v1718_v55 = vmul.f32 %v1712_v48, %v3231_v36  ;;  %v1323_v39 = vrot.slane %v3222_v31, %v1322_v59  ;;  %v1700_v57 = vmul.f32 0.5, %v3231_v36 }
 0x914   :  { %v1723_v17 = vadd.f32 %v1717_v51, %v1605_v16  ;;  %v1720_v56 = vmul.f32 %v1714_v52, %v1609_v21  ;;  %v1725_v61 = vadd.f32 %v1719_v37, %v3229_v33  ;;  %v1722_v2 = vmul.f32 %v1716_v53, %v3235_v45 }
 0x915   :  { %v1724_v0 = vadd.f32 %v1718_v55, %v3231_v36  ;;  %v1721_v1 = vmul.f32 %v1715_v54, %v3237_v58  ;;  %v1703_v48 = vmul.f32 0.5, %v3237_v58  ;;  %v1704_v52 = vmul.f32 0.5, %v3235_v45 }
 0x916   :  { %v1729_v4 = vmul.f32 0.7978846, %v1723_v17  ;;  %v1726_v5 = vadd.f32 %v1720_v56, %v1609_v21  ;;  %v1728_v8 = vadd.f32 %v1722_v2, %v3235_v45  ;;  %v1731_v11 = vmul.f32 0.7978846, %v1725_v61  ;;  %v2180_v45 = vld [vmem:[%s3297_s14] ss:$0 sm:$0xff] }
 0x917   :  { %v1730_v6 = vmul.f32 0.7978846, %v1724_v0  ;;  %v1727_v7 = vadd.f32 %v1721_v1, %v3237_v58  ;;  %v1701_v21 = vmul.f32 0.5, %v3229_v33  ;;  %s2793_s14 = scalar_lea.vmem %s2053_s20, 256 }
 0x918   :  { %2603 = vtanh.f32 %v1729_v4  ;;  %v1732_v9 = vmul.f32 0.7978846, %v1726_v5  ;;  %v1734_v14 = vmul.f32 0.7978846, %v1728_v8  ;;  %p2794_p8 = scmp.ne.s32.totalorder %s2053_s20, %s2793_s14  ;;  %p2799_p10 = scmp.lt.s32.totalorder %s2793_s14, %s2793_s14 }
 0x919   :  { %v1733_v12 = vmul.f32 0.7978846, %v1727_v7 }
 0x91a   :  { %2605 = vtanh.f32 %v1732_v9  ;;  %p2800_p11 = por %p2799_p10, %p2798_p9 }
 0x91b   :  { %2607 = vtanh.f32 %v1730_v6 }
 0x91c   :  { %2609 = vtanh.f32 %v1731_v11  ;;  %p2801_p12 = pnand %p2800_p11, %p2794_p8 }
 0x91d   :  { %2611 = vtanh.f32 %v1733_v12 }
 0x91e   :  { %2613 = vtanh.f32 %v1734_v14 }
 0x922   :  { %v2604_v23 = vpop.eup %2603 }
 0x923   :  { %v1741_v25 = vadd.f32 1.0, %v2604_v23 }
 0x924   :  { %v2606_v26 = vpop.eup %2605 }
 0x925   :  { %v2608_v60 = vpop.eup %2607  ;;  %v1747_v28 = vmul.f32 %v1741_v25, %v1699_v24  ;;  %v1744_v30 = vadd.f32 1.0, %v2606_v26 }
 0x926   :  { %v2610_v32 = vpop.eup %2609  ;;  %v1742_v16 = vadd.f32 1.0, %v2608_v60 }
 0x927   :  { %v2612_v10 = vpop.eup %2611  ;;  %v1753_v22 = vmul.f32 %v1747_v28, %v1650_v63  ;;  %v1750_v15 = vmul.f32 %v1744_v30, %v1702_v29  ;;  %v1743_v40 = vadd.f32 1.0, %v2610_v32 }
 0x928   :  { %v2614_v34 = vpop.eup %2613  ;;  %v1745_v41 = vadd.f32 1.0, %v2612_v10  ;;  %v1748_v47 = vmul.f32 %v1742_v16, %v1700_v57 }
 0x929   :  { %v1756_v19 = vmul.f32 %v1750_v15, %v1654_v13  ;;  %v1746_v46 = vadd.f32 1.0, %v2614_v34  ;;  %v1749_v50 = vmul.f32 %v1743_v40, %v1701_v21 }
 0x92a   :  { %v1751_v53 = vmul.f32 %v1745_v41, %v1703_v48 }
 0x92b   :  { %v1807_v35 = vpack.c.bf16 %v1756_v19, %v1753_v22  ;;  %v1690_v42 = vpop.f32.mrb[12].mxu0  ;;  %v1752_v17 = vmul.f32 %v1746_v46, %v1704_v52 }
 0x92c   :  { %v1691_v44 = vadd.f32 %v1690_v42, %v1319_v38  ;;  %v1692_v43 = vpop.f32.mrb[13].mxu0 }
 0x92d   :  { %v1693_v49 = vadd.f32 %v1692_v43, %v1323_v39  ;;  %v1694_v51 = vpop.f32.mrb[14].mxu0 }
 0x92e   :  { %v1754_v31 = vmul.f32 %v1748_v47, %v1691_v44  ;;  %v1695_v37 = vadd.f32 %v1694_v51, %v1319_v38  ;;  %v1696_v36 = vpop.f32.mrb[15].mxu0 }
 0x92f   :  { %v1755_v54 = vmul.f32 %v1749_v50, %v1693_v49  ;;  %v1697_v55 = vadd.f32 %v1696_v36, %v1323_v39 }
 0x930   :  { %v1757_v56 = vmul.f32 %v1751_v53, %v1695_v37 }
 0x931   :  { %v1758_v33 = vmul.f32 %v1752_v17, %v1697_v55 }
 0x932   :  { %v1808_v61 = vpack.c.bf16 %v1757_v56, %v1754_v31 }
 0x933   :  { %v1809_v0 = vpack.c.bf16 %v1758_v33, %v1755_v54 }
 0x934   :  { %1993 = vmatprep.mubr.bf16.mxu1 %v1808_v61 }
 0x935   :  { %1994 = vmatmul.mubr.bf16.vlgmr.msra.gmra.mrb[24].mxu1 %v1807_v35  ;;  %2366 = vmatmul.mubr.bf16.vlgmr.msra.gmra.mrb[16].mxu0 %v1809_v0 }
 0xa08   :  { %v2259_v58 = vpop.f32.mrb[24].mxu1  ;;  %v2036_v1 = vpop.f32.mrb[16].mxu0 }
 0xa09   :  { %v2260_v2 = vpop.f32.mrb[25].mxu1  ;;  %v2367_v4 = vpop.f32.mrb[17].mxu0 }
 0xa0a   :  { %v2261_v5 = vadd.f32 %v2260_v2, %v2259_v58  ;;  %v2262_v6 = vpop.f32.mrb[26].mxu1  ;;  %v2039_v7 = vpop.f32.mrb[18].mxu0 }
 0xa0b   :  { %v2263_v8 = vpop.f32.mrb[27].mxu1  ;;  %v2368_v9 = vpop.f32.mrb[19].mxu0 }
 0xa0c   :  { %v1996_v11 = vadd.f32 %v2261_v5, %v2180_v45  ;;  %v2264_v12 = vadd.f32 %v2263_v8, %v2262_v6 }
 0xa0e   :  { %v2037_v14 = vadd.f32 %v2036_v1, %v1996_v11  ;;  %v1999_v18 = vadd.f32 %v2264_v12, %v2180_v45 }
 0xa10   :  { %v2040_v20 = vadd.f32 %v2039_v7, %v1999_v18  ;;  %v2043_v23 = vadd.f32 %v2037_v14, %v3195_v62 }
 0xa12   :  { %v2044_v24 = vadd.f32 %v2040_v20, %v3197_v3  ;;  %2045 = vst [vmem:[#allocation16] sm:$0xff] %v2043_v23 }
 0xa14   :  { %2046 = vst [vmem:[#allocation16 + $0x8] sm:$0xff] %v2044_v24 }
 0xa15   :  { %2804 = shalt.err (!%p2801_p12)
}
 0xa16   :  { %s2805_s2 = scalar_lea.hbm %s3300_s17, 256 }
 0xa17   :  { %p2806_p13 = scmp.ne.s32.totalorder %s3300_s17, %s2805_s2  ;;  %p2809_p0 = scmp.lt.u32.totalorder %s2805_s2, %s3300_s17 }
 0xa19   :  { %p2811_p1 = pnand %p2809_p0, %p2806_p13 }
 0xa1b   :  { %2814 = shalt.err (!%p2811_p1)
}
 0xa1c   :  { %2058 = dma.vmem_to_hbm [thread:$0]  %s2053_s20, 256, %s3300_s17, [#allocation4], %s3310_s6, %s3310_s6, %s3309_s23  }
 0xa1d   :  { %2825 = dma.done.wait [#allocation4], 256  }
 0xa1e   :  { %2826 = vsyncadd [#allocation4], 4294967040 }
 0xa1f   :  { %2062 = vsyncpa [#allocation3], 1 }
 0xa20   :  { %2063 = vsyncpa [#allocation6], 1 }
 0xa21   :  { %2064 = vsyncpa [#allocation9], 1 }
 0xa22   :  { %2065 = vsyncpa [#allocation12], 1 }
 0xa23   :  { %2066 = vsyncpa [#allocation15], 1 }
 0xa24   :  { %2067 = vsyncpa [#allocation4], 1 }

</bundles_post_ra>
